<compile_context>
chip_gen: v7x
topology: tpu7x:2x2x1
jax: 0.10.0
libtpu: 0.0.40
codegen_flags: <defaults>
</compile_context>

<pallas_src>
import functools

import jax
import jax.numpy as jnp
from jax.experimental import pallas as pl
from jax.experimental.pallas import tpu as pltpu


# ---------------------------------------------------------------------------
# Small helpers
# ---------------------------------------------------------------------------
def _round_up(n, m):
    return ((n + m - 1) // m) * m


def _largest_divisor_at_most(n, target):
    t = max(1, min(n, target))
    while n % t:
        t -= 1
    return t


def _vmem_limit_bytes(est_bytes):
    # Raise the scoped-VMEM budget above the per-generation defaults
    # (16 MiB v5e / 32 MiB v6e,v7x) with generous headroom, but clamp to
    # 64 MiB so the request is legal on every generation (v7x physical VMEM).
    return int(min(max(2 * est_bytes + (4 << 20), 32 << 20), 64 << 20))


# ---------------------------------------------------------------------------
# Kernel 1: LSTM layer. The chunk-wide input projection (time-parallel part)
# is fused in front of the serial loop; only h @ W_hh^T stays per-timestep.
# Grid = (batch_tiles, time_chunks); h/c state lives in VMEM scratch and is
# carried across the (sequential) time-chunk axis. Weights are staged once
# per batch-tile sweep into single-buffered VMEM scratch by a manual DMA.
# ---------------------------------------------------------------------------
def _lstm_recurrence_kernel(x_ref, w_ih_hbm, w_hh_hbm, b_ref, h0_ref, c0_ref,
                            out_ref, hT_ref, cT_ref,
                            w_ih_sc, w_hh_sc, h_sc, c_sc, gx_sc, dma_sem,
                            *, nhid_p, t_chunk, b_tile):
    tc = pl.program_id(1)

    @pl.when(tc == 0)
    def _():
        # Stage the (constant-index) weights into single-buffered VMEM
        # scratch: halves weight residency vs. the default double-buffered
        # BlockSpec pipeline, and is re-done at the start of each batch-tile
        # sweep so it stays correct when the "parallel" axis is core-sharded.
        cp_ih = pltpu.make_async_copy(w_ih_hbm, w_ih_sc, dma_sem.at[0])
        cp_hh = pltpu.make_async_copy(w_hh_hbm, w_hh_sc, dma_sem.at[1])
        cp_ih.start()
        cp_hh.start()
        cp_ih.wait()
        cp_hh.wait()
        h_sc[...] = h0_ref[...]
        c_sc[...] = c0_ref[...]

    w_ih = w_ih_sc[...]
    w_hh = w_hh_sc[...]

    # Fused, chunk-wide input projection on the MXU (time-parallel part).
    # For the default (untiled-batch) path x_ref is already 2-D and this
    # reshape is a no-op; for the batch-tiled path the collapse is layout
    # preserving because b_tile % 8 == 0 and in_p % 128 == 0.
    x2d = x_ref[...].reshape(t_chunk * b_tile, x_ref.shape[-1])
    gx_sc[...] = (
        jnp.dot(x2d.astype(w_ih.dtype), w_ih,
                preferred_element_type=jnp.float32) + b_ref[...])

    h = h_sc[...]
    c = c_sc[...]
    H = nhid_p
    # Static unroll over the chunk; all slices/stores below are lane/sublane
    # aligned because nhid is padded to a multiple of 128 and the batch to a
    # multiple of 8.
    # TODO(synk): at very large nhid a partially-unrolled fori_loop may be
    # preferable to avoid vreg spills.
    for i in range(t_chunk):
        gates = gx_sc[i * b_tile:(i + 1) * b_tile, :] + jnp.dot(
            h.astype(w_hh.dtype), w_hh, preferred_element_type=jnp.float32)
        # PyTorch gate order: input, forget, cell(g), output
        i_g = jax.nn.sigmoid(gates[:, 0 * H:1 * H])
        f_g = jax.nn.sigmoid(gates[:, 1 * H:2 * H])
        g_g = jnp.tanh(gates[:, 2 * H:3 * H])
        o_g = jax.nn.sigmoid(gates[:, 3 * H:4 * H])
        c = f_g * c + i_g * g_g
        h = o_g * jnp.tanh(c)
        out_ref[i] = h

    h_sc[...] = h
    c_sc[...] = c

    @pl.when(tc == pl.num_programs(1) - 1)
    def _():
        hT_ref[...] = h
        cT_ref[...] = c


def lstm_layer(x, w_ihT, w_hhT, bias, h0, c0, *,
               time_chunk_target=32, batch_tile=None):
    """One LSTM layer over the full (padded) sequence.

    x:     (T, Bp, in_p) f32 with Bp % 8 == 0 and in_p % 128 == 0
    w_ihT: (in_p, 4*Hp)   w_hhT: (Hp, 4*Hp)   bias: (4*Hp,) = b_ih + b_hh
    h0/c0: (Bp, Hp)
    returns out (T, Bp, Hp), hT (Bp, Hp), cT (Bp, Hp)
    """
    T, Bp, in_p = x.shape
    Hp = h0.shape[-1]
    wdt = w_ihT.dtype

    t_chunk = _largest_divisor_at_most(T, time_chunk_target)
    if batch_tile is None:
        b_tile = Bp
    else:
        b_tile = batch_tile
        assert b_tile % 8 == 0 and Bp % b_tile == 0, (
            "batch_tile must be a multiple of 8 dividing the padded batch")
    grid = (Bp // b_tile, T // t_chunk)

    if b_tile == Bp:
        # (T, Bp, in_p) and (T*Bp, in_p) have identical tiled layouts here,
        # so present the time chunk as a 2-D block (no in-kernel relayout).
        x_in = x.reshape(T * Bp, in_p)
        x_spec = pl.BlockSpec((t_chunk * Bp, in_p), lambda bt, tc: (tc, 0))
    else:
        # Batch-tiled (v7x megacore) path.
        x_in = x
        x_spec = pl.BlockSpec((t_chunk, b_tile, in_p),
                              lambda bt, tc: (tc, bt, 0))

    wsize = jnp.dtype(wdt).itemsize
    est = (2 * t_chunk * b_tile * in_p * 4          # x block (double-buffered)
           + 2 * 4 * Hp * 4                         # bias block
           + 4 * 2 * b_tile * Hp * 4                # h0/c0 in + hT/cT out
           + 2 * t_chunk * b_tile * Hp * 4          # out block
           + (in_p + Hp) * 4 * Hp * wsize           # weight scratch (single)
           + 2 * b_tile * Hp * 4                    # h/c scratch
           + t_chunk * b_tile * 4 * Hp * 4)         # gates scratch

    kernel = functools.partial(_lstm_recurrence_kernel,
                               nhid_p=Hp, t_chunk=t_chunk, b_tile=b_tile)
    out, hT, cT = pl.pallas_call(
        kernel,
        out_shape=(
            jax.ShapeDtypeStruct((T, Bp, Hp), jnp.float32),
            jax.ShapeDtypeStruct((Bp, Hp), jnp.float32),
            jax.ShapeDtypeStruct((Bp, Hp), jnp.float32),
        ),
        grid_spec=pltpu.PrefetchScalarGridSpec(
            num_scalar_prefetch=0,
            grid=grid,
            in_specs=[
                x_spec,
                pl.BlockSpec(memory_space=pl.ANY),      # w_ihT (manual stage)
                pl.BlockSpec(memory_space=pl.ANY),      # w_hhT (manual stage)
                pl.BlockSpec((1, 4 * Hp), lambda bt, tc: (0, 0)),
                pl.BlockSpec((b_tile, Hp), lambda bt, tc: (bt, 0)),
                pl.BlockSpec((b_tile, Hp), lambda bt, tc: (bt, 0)),
            ],
            out_specs=[
                pl.BlockSpec((t_chunk, b_tile, Hp),
                             lambda bt, tc: (tc, bt, 0)),
                pl.BlockSpec((b_tile, Hp), lambda bt, tc: (bt, 0)),
                pl.BlockSpec((b_tile, Hp), lambda bt, tc: (bt, 0)),
            ],
            scratch_shapes=[
                pltpu.VMEM((in_p, 4 * Hp), wdt),
                pltpu.VMEM((Hp, 4 * Hp), wdt),
                pltpu.VMEM((b_tile, Hp), jnp.float32),
                pltpu.VMEM((b_tile, Hp), jnp.float32),
                pltpu.VMEM((t_chunk * b_tile, 4 * Hp), jnp.float32),
                pltpu.SemaphoreType.DMA((2,)),
            ],
        ),
        compiler_params=pltpu.CompilerParams(
            dimension_semantics=("parallel", "arbitrary"),
            vmem_limit_bytes=_vmem_limit_bytes(est)),
    )(x_in, w_ihT, w_hhT, bias.reshape(1, 4 * Hp), h0, c0)
    return out, hT, cT


# ---------------------------------------------------------------------------
# Kernel 2: decoder Linear(nhid -> ntoken) + log_softmax, tiled over BOTH the
# row and the vocab dimension. Pass 0 of the middle grid axis accumulates the
# per-row running max / log-sum-exp in VMEM scratch across the vocab tiles;
# pass 1 recomputes each logits tile and writes the normalized log-probs.
# ---------------------------------------------------------------------------
def _decoder_kernel(x_ref, w_ref, b_ref, out_ref, m_sc, l_sc):
    p = pl.program_id(1)     # 0: accumulate row max / LSE, 1: emit output
    j = pl.program_id(2)     # vocab tile

    @pl.when(jnp.logical_and(p == 0, j == 0))
    def _():
        m_sc[...] = jnp.full_like(m_sc, -jnp.inf)
        l_sc[...] = jnp.zeros_like(l_sc)

    logits = (jnp.dot(x_ref[...], w_ref[...],
                      preferred_element_type=jnp.float32) + b_ref[...])

    @pl.when(p == 0)
    def _():
        m_prev = m_sc[...]
        m_new = jnp.maximum(m_prev, jnp.max(logits, axis=-1, keepdims=True))
        alpha = jnp.exp(m_prev - m_new)
        l_sc[...] = alpha * l_sc[...] + jnp.sum(jnp.exp(logits - m_new),
                                                axis=-1, keepdims=True)
        m_sc[...] = m_new

    @pl.when(p == 1)
    def _():
        out_ref[...] = logits - (m_sc[...] + jnp.log(l_sc[...]))


def decoder_logsoftmax(x_flat, dec_wT, dec_b, *,
                       row_tile_target=256, vocab_tile_target=2048):
    """x_flat: (N, Hp); dec_wT: (Hp, Vp); dec_b: (Vp,). Returns (N, Vp)."""
    N, Hp = x_flat.shape
    Vp = dec_wT.shape[1]
    x_flat = x_flat.astype(dec_wT.dtype)

    tn = N if N <= row_tile_target else row_tile_target
    tv = 128 * _largest_divisor_at_most(Vp // 128,
                                        max(1, vocab_tile_target // 128))
    n_vt = Vp // tv
    grid = (pl.cdiv(N, tn), 2, n_vt)

    wsize = jnp.dtype(dec_wT.dtype).itemsize
    est = (2 * tn * Hp * wsize + 2 * Hp * tv * wsize + 2 * tv * 4
           + 2 * tn * tv * 4 + 2 * tn * 4)

    return pl.pallas_call(
        _decoder_kernel,
        out_shape=jax.ShapeDtypeStruct((N, Vp), jnp.float32),
        grid_spec=pltpu.PrefetchScalarGridSpec(
            num_scalar_prefetch=0,
            grid=grid,
            in_specs=[
                pl.BlockSpec((tn, Hp), lambda i, p, j: (i, 0)),
                pl.BlockSpec((Hp, tv), lambda i, p, j: (0, j)),
                pl.BlockSpec((1, tv), lambda i, p, j: (0, j)),
            ],
            # The out block index is held constant during pass 0 (nothing is
            # written there), so every (row, vocab) tile is flushed to HBM
            # exactly once, with the pass-1 (normalized) contents.
            out_specs=pl.BlockSpec((tn, tv), lambda i, p, j: (i, p * j)),
            scratch_shapes=[
                pltpu.VMEM((tn, 1), jnp.float32),
                pltpu.VMEM((tn, 1), jnp.float32),
            ],
        ),
        compiler_params=pltpu.CompilerParams(
            dimension_semantics=("parallel", "arbitrary", "arbitrary"),
            vmem_limit_bytes=_vmem_limit_bytes(est)),
    )(x_flat, dec_wT, dec_b.reshape(1, Vp))


# ---------------------------------------------------------------------------
# Parameters (PyTorch layout) + one-time kernel-layout preparation
# ---------------------------------------------------------------------------
def init_params(key, ntoken, ninp, nhid, nlayers):
    keys = jax.random.split(key, 2 + 4 * nlayers)
    initrange = 0.1
    params = {
        "encoder_w": jax.random.uniform(keys[0], (ntoken, ninp),
                                        minval=-initrange, maxval=initrange,
                                        dtype=jnp.float32),
        "decoder_w": jax.random.uniform(keys[1], (ntoken, nhid),
                                        minval=-initrange, maxval=initrange,
                                        dtype=jnp.float32),
        "decoder_b": jnp.zeros((ntoken,), jnp.float32),
        "lstm": [],
    }
    stdv = 1.0 / (nhid ** 0.5)
    for layer in range(nlayers):
        in_dim = ninp if layer == 0 else nhid
        k = keys[2 + 4 * layer: 2 + 4 * (layer + 1)]
        params["lstm"].append({
            "w_ih": jax.random.uniform(k[0], (4 * nhid, in_dim),
                                       minval=-stdv, maxval=stdv,
                                       dtype=jnp.float32),
            "w_hh": jax.random.uniform(k[1], (4 * nhid, nhid),
                                       minval=-stdv, maxval=stdv,
                                       dtype=jnp.float32),
            "b_ih": jax.random.uniform(k[2], (4 * nhid,),
                                       minval=-stdv, maxval=stdv,
                                       dtype=jnp.float32),
            "b_hh": jax.random.uniform(k[3], (4 * nhid,),
                                       minval=-stdv, maxval=stdv,
                                       dtype=jnp.float32),
        })
    return params


def _pad_gate_rows(w, nhid, nhid_p):
    """(4*nhid, in) -> (4*nhid_p, in), zero-padding each PyTorch gate block."""
    w4 = w.reshape(4, nhid, w.shape[-1])
    w4 = jnp.pad(w4, ((0, 0), (0, nhid_p - nhid), (0, 0)))
    return w4.reshape(4 * nhid_p, w.shape[-1])


def _pad_gate_vec(b, nhid, nhid_p):
    b4 = jnp.pad(b.reshape(4, nhid), ((0, 0), (0, nhid_p - nhid)))
    return b4.reshape(4 * nhid_p)


def prepare_kernel_params(params, *, param_dtype=jnp.float32):
    """One-time layout change for the kernels:
      * pad ninp / nhid / ntoken up to multiples of 128 (lane-aligned gate
        slices and lane-dense logits stores); padding is exact (zero pads for
        weights/state, -inf pads for the decoder bias),
      * pre-transpose weights for last-dim contraction (no in-kernel .T),
      * fold the two LSTM biases together,
      * optionally cast the matmul weights to bfloat16 (gate math stays f32).
    """
    ntoken, ninp = params["encoder_w"].shape
    nhid = params["decoder_w"].shape[1]
    ninp_p = _round_up(ninp, 128)
    nhid_p = _round_up(nhid, 128)
    ntoken_p = _round_up(ntoken, 128)

    kp = {
        "ntoken": ntoken, "nhid": nhid,
        "ninp_p": ninp_p, "nhid_p": nhid_p, "ntoken_p": ntoken_p,
        "encoder_w": jnp.pad(params["encoder_w"],
                             ((0, 0), (0, ninp_p - ninp))),
        "decoder_wT": jnp.pad(params["decoder_w"].T,
                              ((0, nhid_p - nhid),
                               (0, ntoken_p - ntoken))).astype(param_dtype),
        # -inf bias on pad columns => exp() == 0, so log_softmax over the
        # padded vocab is exact for the real columns.
        "decoder_b": jnp.pad(params["decoder_b"], (0, ntoken_p - ntoken),
                             constant_values=-jnp.inf),
        "lstm": [],
    }
    for p in params["lstm"]:
        in_dim = p["w_ih"].shape[1]
        in_p = _round_up(in_dim, 128)
        w_ih = _pad_gate_rows(p["w_ih"], nhid, nhid_p)
        w_ih = jnp.pad(w_ih, ((0, 0), (0, in_p - in_dim)))
        w_hh = _pad_gate_rows(p["w_hh"], nhid, nhid_p)
        w_hh = jnp.pad(w_hh, ((0, 0), (0, nhid_p - nhid)))
        kp["lstm"].append({
            "w_ihT": w_ih.T.astype(param_dtype),        # (in_p, 4*Hp)
            "w_hhT": w_hh.T.astype(param_dtype),        # (Hp, 4*Hp)
            "bias": _pad_gate_vec(p["b_ih"] + p["b_hh"], nhid, nhid_p),
        })
    return kp


# ---------------------------------------------------------------------------
# Full RNNModel forward (LSTM variant)
# ---------------------------------------------------------------------------
def rnn_model_forward(kparams, token_ids, hidden, *, batch_tile=None):
    """token_ids: (T, B) int32; hidden: (h0, c0) each (nlayers, B, nhid)."""
    h0_all, c0_all = hidden
    nlayers, B, nhid = h0_all.shape
    T = token_ids.shape[0]
    nhid_p = kparams["nhid_p"]
    Bp = _round_up(B, 8)          # sublane-aligned batch (padded rows stay 0)

    # Embedding lookup (gather, plain-JAX glue) + dropout -> identity (eval).
    # TODO(synk): the gather could be fused into the layer-0 projection via
    # scalar-prefetched row indices; kept as an XLA gather here.
    x = kparams["encoder_w"][token_ids]                      # (T, B, ninp_p)
    x = jnp.pad(x, ((0, 0), (0, Bp - B), (0, 0)))
    h0p = jnp.pad(h0_all, ((0, 0), (0, Bp - B), (0, nhid_p - nhid)))
    c0p = jnp.pad(c0_all, ((0, 0), (0, Bp - B), (0, nhid_p - nhid)))

    h_fin, c_fin = [], []
    for layer in range(nlayers):
        p = kparams["lstm"][layer]
        x, hT, cT = lstm_layer(x, p["w_ihT"], p["w_hhT"], p["bias"],
                               h0p[layer], c0p[layer], batch_tile=batch_tile)
        h_fin.append(hT[:B, :nhid])
        c_fin.append(cT[:B, :nhid])
        # inter-layer / output dropout -> identity in eval mode

    x = x[:, :B, :]                                          # drop batch pad
    log_probs = decoder_logsoftmax(x.reshape(T * B, nhid_p),
                                   kparams["decoder_wT"],
                                   kparams["decoder_b"])
    log_probs = log_probs[:, :kparams["ntoken"]]             # drop vocab pad
    return log_probs, (jnp.stack(h_fin, axis=0), jnp.stack(c_fin, axis=0))


# ---------------------------------------------------------------------------
# Pure-JAX reference (PyTorch semantics) for the numerical check
# ---------------------------------------------------------------------------
def _reference_forward(params, token_ids, hidden):
    h0_all, c0_all = hidden
    nhid = h0_all.shape[-1]
    x = params["encoder_w"][token_ids]
    hs, cs = [], []
    for layer, p in enumerate(params["lstm"]):
        T = x.shape[0]
        h, c = h0_all[layer], c0_all[layer]
        outs = []
        for t in range(T):
            gates = (x[t] @ p["w_ih"].T + h @ p["w_hh"].T
                     + p["b_ih"] + p["b_hh"])
            i_g = jax.nn.sigmoid(gates[:, :nhid])
            f_g = jax.nn.sigmoid(gates[:, nhid:2 * nhid])
            g_g = jnp.tanh(gates[:, 2 * nhid:3 * nhid])
            o_g = jax.nn.sigmoid(gates[:, 3 * nhid:])
            c = f_g * c + i_g * g_g
            h = o_g * jnp.tanh(c)
            outs.append(h)
        x = jnp.stack(outs, axis=0)
        hs.append(h)
        cs.append(c)
    logits = (x.reshape(-1, nhid) @ params["decoder_w"].T
              + params["decoder_b"])
    return (jax.nn.log_softmax(logits, axis=-1),
            (jnp.stack(hs, axis=0), jnp.stack(cs, axis=0)))


if __name__ == "__main__":
    # Small deterministic config: LSTM, ntoken=50, ninp=32, nhid=32, nlayers=2
    ntoken, ninp, nhid, nlayers = 50, 32, 32, 2
    T, B = 8, 2

    key = jax.random.PRNGKey(0)
    pkey, dkey, hkey, ckey = jax.random.split(key, 4)
    params = init_params(pkey, ntoken, ninp, nhid, nlayers)

    token_ids = jax.random.randint(dkey, (T, B), 0, ntoken, dtype=jnp.int32)
    h0 = 0.1 * jax.random.normal(hkey, (nlayers, B, nhid), jnp.float32)
    c0 = 0.1 * jax.random.normal(ckey, (nlayers, B, nhid), jnp.float32)

    ref_lp, (ref_h, ref_c) = _reference_forward(params, token_ids, (h0, c0))

    # ---- f32 weights: strict check against the PyTorch-semantics reference.
    kparams = prepare_kernel_params(params, param_dtype=jnp.float32)
    log_probs, (hT, cT) = rnn_model_forward(kparams, token_ids, (h0, c0))
    jax.block_until_ready((log_probs, hT, cT))

    assert log_probs.shape == (T * B, ntoken)
    assert hT.shape == (nlayers, B, nhid) and cT.shape == (nlayers, B, nhid)
    row_sums = jnp.exp(log_probs).sum(axis=-1)
    assert bool(jnp.all(jnp.abs(row_sums - 1.0) < 1e-4))
    assert bool(jnp.allclose(log_probs, ref_lp, atol=1e-4, rtol=1e-4))
    assert bool(jnp.allclose(hT, ref_h, atol=1e-4, rtol=1e-4))
    assert bool(jnp.allclose(cT, ref_c, atol=1e-4, rtol=1e-4))

    # ---- bf16 matmul weights (MXU-rate / VMEM-residency optimization):
    # sanity check only (gate math stays f32, loose tolerance on the logits).
    kparams16 = prepare_kernel_params(params, param_dtype=jnp.bfloat16)
    lp16, (h16, c16) = rnn_model_forward(kparams16, token_ids, (h0, c0))
    jax.block_until_ready((lp16, h16, c16))
    assert lp16.shape == (T * B, ntoken)
    assert bool(jnp.all(jnp.abs(jnp.exp(lp16).sum(axis=-1) - 1.0) < 1e-3))
    assert bool(jnp.max(jnp.abs(lp16 - ref_lp)) < 0.5)

    print("KERNEL_OK")
</pallas_src>

<mosaic_0001>
module attributes {stable_mosaic.version = 11 : i64} {
  func.func @_lstm_recurrence_kernel(%arg0: i32, %arg1: i32, %arg2: memref<64x128xf32, #tpu.memory_space<vmem>>, %arg3: memref<128x512xf32, #tpu.memory_space<any>>, %arg4: memref<128x512xf32, #tpu.memory_space<any>>, %arg5: memref<1x512xf32, #tpu.memory_space<vmem>>, %arg6: memref<8x128xf32, #tpu.memory_space<vmem>>, %arg7: memref<8x128xf32, #tpu.memory_space<vmem>>, %arg8: memref<8x8x128xf32, #tpu.memory_space<vmem>>, %arg9: memref<8x128xf32, #tpu.memory_space<vmem>>, %arg10: memref<8x128xf32, #tpu.memory_space<vmem>>, %arg11: memref<128x512xf32, #tpu.memory_space<vmem>>, %arg12: memref<128x512xf32, #tpu.memory_space<vmem>>, %arg13: memref<8x128xf32, #tpu.memory_space<vmem>>, %arg14: memref<8x128xf32, #tpu.memory_space<vmem>>, %arg15: memref<64x512xf32, #tpu.memory_space<vmem>>, %arg16: memref<2x!tpu.dma_semaphore, #tpu.memory_space<semaphore_mem>>) attributes {dimension_semantics = [#tpu.dimension_semantics<parallel>, #tpu.dimension_semantics<arbitrary>], iteration_bounds = array<i64: 1, 1>, scalar_prefetch = 0 : i64, scratch_operands = 6 : i64, tpu.core_type = #tpu.core_type<tc>, window_params = [{transform_indices = @transform_0, window_bounds = array<i64: 64, 128>}, {}, {}, {pipeline_mode = #tpu.pipeline_mode<synchronous>, transform_indices = @transform_3, window_bounds = array<i64: 1, 512>}, {transform_indices = @transform_4, window_bounds = array<i64: 8, 128>}, {transform_indices = @transform_5, window_bounds = array<i64: 8, 128>}, {transform_indices = @transform_6, window_bounds = array<i64: 8, 8, 128>}, {transform_indices = @transform_7, window_bounds = array<i64: 8, 128>}, {transform_indices = @transform_8, window_bounds = array<i64: 8, 128>}]} {
    %c0_i32 = arith.constant 0 : i32
    %0 = arith.cmpi eq, %arg1, %c0_i32 : i32
    %1 = arith.extui %0 : i1 to i32
    %c0_i32_0 = arith.constant 0 : i32
    %2 = arith.cmpi ne, %1, %c0_i32_0 : i32
    scf.if %2 {
      %c0_i32_78 = arith.constant 0 : i32
      %266 = tpu.memref_slice %arg16[%c0_i32_78] : memref<2x!tpu.dma_semaphore, #tpu.memory_space<semaphore_mem>> -> memref<1x!tpu.dma_semaphore, #tpu.memory_space<semaphore_mem>>
      %267 = tpu.memref_squeeze %266 : memref<1x!tpu.dma_semaphore, #tpu.memory_space<semaphore_mem>> -> memref<!tpu.dma_semaphore, #tpu.memory_space<semaphore_mem>>
      tpu.enqueue_dma source(%arg3 : memref<128x512xf32, #tpu.memory_space<any>>) target(%arg11 : memref<128x512xf32, #tpu.memory_space<vmem>>) target_semaphore(%267 : memref<!tpu.dma_semaphore, #tpu.memory_space<semaphore_mem>>)
      %c1_i32 = arith.constant 1 : i32
      %268 = tpu.memref_slice %arg16[%c1_i32] : memref<2x!tpu.dma_semaphore, #tpu.memory_space<semaphore_mem>> -> memref<1x!tpu.dma_semaphore, #tpu.memory_space<semaphore_mem>>
      %269 = tpu.memref_squeeze %268 : memref<1x!tpu.dma_semaphore, #tpu.memory_space<semaphore_mem>> -> memref<!tpu.dma_semaphore, #tpu.memory_space<semaphore_mem>>
      tpu.enqueue_dma source(%arg4 : memref<128x512xf32, #tpu.memory_space<any>>) target(%arg12 : memref<128x512xf32, #tpu.memory_space<vmem>>) target_semaphore(%269 : memref<!tpu.dma_semaphore, #tpu.memory_space<semaphore_mem>>)
      %c0_i32_79 = arith.constant 0 : i32
      %270 = tpu.memref_slice %arg16[%c0_i32_79] : memref<2x!tpu.dma_semaphore, #tpu.memory_space<semaphore_mem>> -> memref<1x!tpu.dma_semaphore, #tpu.memory_space<semaphore_mem>>
      %271 = tpu.memref_squeeze %270 : memref<1x!tpu.dma_semaphore, #tpu.memory_space<semaphore_mem>> -> memref<!tpu.dma_semaphore, #tpu.memory_space<semaphore_mem>>
      tpu.wait_dma2 semaphore(%271 : memref<!tpu.dma_semaphore, #tpu.memory_space<semaphore_mem>>) src(%arg3 : memref<128x512xf32, #tpu.memory_space<any>>) dst(%arg11 : memref<128x512xf32, #tpu.memory_space<vmem>>)
      %c1_i32_80 = arith.constant 1 : i32
      %272 = tpu.memref_slice %arg16[%c1_i32_80] : memref<2x!tpu.dma_semaphore, #tpu.memory_space<semaphore_mem>> -> memref<1x!tpu.dma_semaphore, #tpu.memory_space<semaphore_mem>>
      %273 = tpu.memref_squeeze %272 : memref<1x!tpu.dma_semaphore, #tpu.memory_space<semaphore_mem>> -> memref<!tpu.dma_semaphore, #tpu.memory_space<semaphore_mem>>
      tpu.wait_dma2 semaphore(%273 : memref<!tpu.dma_semaphore, #tpu.memory_space<semaphore_mem>>) src(%arg4 : memref<128x512xf32, #tpu.memory_space<any>>) dst(%arg12 : memref<128x512xf32, #tpu.memory_space<vmem>>)
      %c0_81 = arith.constant 0 : index
      %c0_82 = arith.constant 0 : index
      %274 = vector.load %arg6[%c0_81, %c0_82] : memref<8x128xf32, #tpu.memory_space<vmem>>, vector<8x128xf32>
      %c0_83 = arith.constant 0 : index
      %c0_84 = arith.constant 0 : index
      %275 = vector.load %arg13[%c0_83, %c0_84] : memref<8x128xf32, #tpu.memory_space<vmem>>, vector<8x128xf32>
      tpu.vector_store %arg13[%c0_83, %c0_84], %274 {strides = array<i32>} : memref<8x128xf32, #tpu.memory_space<vmem>>, vector<8x128xf32>,
      %c0_85 = arith.constant 0 : index
      %c0_86 = arith.constant 0 : index
      %276 = vector.load %arg7[%c0_85, %c0_86] : memref<8x128xf32, #tpu.memory_space<vmem>>, vector<8x128xf32>
      %c0_87 = arith.constant 0 : index
      %c0_88 = arith.constant 0 : index
      %277 = vector.load %arg14[%c0_87, %c0_88] : memref<8x128xf32, #tpu.memory_space<vmem>>, vector<8x128xf32>
      tpu.vector_store %arg14[%c0_87, %c0_88], %276 {strides = array<i32>} : memref<8x128xf32, #tpu.memory_space<vmem>>, vector<8x128xf32>,
    } else {
    }
    %c0 = arith.constant 0 : index
    %c0_1 = arith.constant 0 : index
    %3 = vector.load %arg11[%c0, %c0_1] : memref<128x512xf32, #tpu.memory_space<vmem>>, vector<128x512xf32>
    %c0_2 = arith.constant 0 : index
    %c0_3 = arith.constant 0 : index
    %4 = vector.load %arg12[%c0_2, %c0_3] : memref<128x512xf32, #tpu.memory_space<vmem>>, vector<128x512xf32>
    %c0_4 = arith.constant 0 : index
    %c0_5 = arith.constant 0 : index
    %5 = vector.load %arg2[%c0_4, %c0_5] : memref<64x128xf32, #tpu.memory_space<vmem>>, vector<64x128xf32>
    %cst = arith.constant dense<0.000000e+00> : vector<64x512xf32>
    %6 = tpu.matmul %5, %3, %cst {dimension_numbers = #tpu.dot_dimension_numbers<[1], [0], [0], [1], [0, 0, 1, 1], [], []>} : vector<64x128xf32>, vector<128x512xf32>, vector<64x512xf32> -> vector<64x512xf32>
    %c0_6 = arith.constant 0 : index
    %c0_7 = arith.constant 0 : index
    %7 = vector.load %arg5[%c0_6, %c0_7] : memref<1x512xf32, #tpu.memory_space<vmem>>, vector<1x512xf32>
    %8 = vector.broadcast %7 : vector<1x512xf32> to vector<64x512xf32>
    %9 = arith.addf %6, %8 : vector<64x512xf32>
    %c0_8 = arith.constant 0 : index
    %c0_9 = arith.constant 0 : index
    %10 = vector.load %arg15[%c0_8, %c0_9] : memref<64x512xf32, #tpu.memory_space<vmem>>, vector<64x512xf32>
    tpu.vector_store %arg15[%c0_8, %c0_9], %9 {strides = array<i32>} : memref<64x512xf32, #tpu.memory_space<vmem>>, vector<64x512xf32>,
    %c0_10 = arith.constant 0 : index
    %c0_11 = arith.constant 0 : index
    %11 = vector.load %arg13[%c0_10, %c0_11] : memref<8x128xf32, #tpu.memory_space<vmem>>, vector<8x128xf32>
    %c0_12 = arith.constant 0 : index
    %c0_13 = arith.constant 0 : index
    %12 = vector.load %arg14[%c0_12, %c0_13] : memref<8x128xf32, #tpu.memory_space<vmem>>, vector<8x128xf32>
    %c0_14 = arith.constant 0 : index
    %c0_15 = arith.constant 0 : index
    %13 = vector.load %arg15[%c0_14, %c0_15] : memref<64x512xf32, #tpu.memory_space<vmem>>, vector<8x512xf32>
    %cst_16 = arith.constant dense<0.000000e+00> : vector<8x512xf32>
    %14 = tpu.matmul %11, %4, %cst_16 {dimension_numbers = #tpu.dot_dimension_numbers<[1], [0], [0], [1], [0, 0, 1, 1], [], []>} : vector<8x128xf32>, vector<128x512xf32>, vector<8x512xf32> -> vector<8x512xf32>
    %15 = arith.addf %13, %14 : vector<8x512xf32>
    %16 = vector.extract_strided_slice %15 {offsets = [0, 0], sizes = [8, 128], strides = [1, 1]} : vector<8x512xf32> to vector<8x128xf32>
    %17 = arith.negf %16 : vector<8x128xf32>
    %18 = math.exp %17 : vector<8x128xf32>
    %cst_17 = arith.constant 1.000000e+00 : f32
    %19 = vector.broadcast %cst_17 : f32 to vector<8x128xf32>
    %20 = arith.addf %19, %18 : vector<8x128xf32>
    %21 = arith.divf %19, %20 : vector<8x128xf32>
    %22 = vector.extract_strided_slice %15 {offsets = [0, 128], sizes = [8, 128], strides = [1, 1]} : vector<8x512xf32> to vector<8x128xf32>
    %23 = arith.negf %22 : vector<8x128xf32>
    %24 = math.exp %23 : vector<8x128xf32>
    %cst_18 = arith.constant 1.000000e+00 : f32
    %25 = vector.broadcast %cst_18 : f32 to vector<8x128xf32>
    %26 = arith.addf %25, %24 : vector<8x128xf32>
    %27 = arith.divf %25, %26 : vector<8x128xf32>
    %28 = vector.extract_strided_slice %15 {offsets = [0, 256], sizes = [8, 128], strides = [1, 1]} : vector<8x512xf32> to vector<8x128xf32>
    %29 = math.tanh %28 : vector<8x128xf32>
    %30 = vector.extract_strided_slice %15 {offsets = [0, 384], sizes = [8, 128], strides = [1, 1]} : vector<8x512xf32> to vector<8x128xf32>
    %31 = arith.negf %30 : vector<8x128xf32>
    %32 = math.exp %31 : vector<8x128xf32>
    %cst_19 = arith.constant 1.000000e+00 : f32
    %33 = vector.broadcast %cst_19 : f32 to vector<8x128xf32>
    %34 = arith.addf %33, %32 : vector<8x128xf32>
    %35 = arith.divf %33, %34 : vector<8x128xf32>
    %36 = arith.mulf %27, %12 : vector<8x128xf32>
    %37 = arith.mulf %21, %29 : vector<8x128xf32>
    %38 = arith.addf %36, %37 : vector<8x128xf32>
    %39 = math.tanh %38 : vector<8x128xf32>
    %40 = arith.mulf %35, %39 : vector<8x128xf32>
    %c0_20 = arith.constant 0 : index
    %c0_21 = arith.constant 0 : index
    %c0_22 = arith.constant 0 : index
    %41 = vector.load %arg8[%c0_20, %c0_21, %c0_22] : memref<8x8x128xf32, #tpu.memory_space<vmem>>, vector<1x8x128xf32>
    %42 = vector.shape_cast %41 : vector<1x8x128xf32> to vector<8x128xf32>
    %43 = vector.shape_cast %40 : vector<8x128xf32> to vector<1x8x128xf32>
    tpu.vector_store %arg8[%c0_20, %c0_21, %c0_22], %43 {strides = array<i32>} : memref<8x8x128xf32, #tpu.memory_space<vmem>>, vector<1x8x128xf32>,
    %c8 = arith.constant 8 : index
    %c0_23 = arith.constant 0 : index
    %44 = vector.load %arg15[%c8, %c0_23] : memref<64x512xf32, #tpu.memory_space<vmem>>, vector<8x512xf32>
    %cst_24 = arith.constant dense<0.000000e+00> : vector<8x512xf32>
    %45 = tpu.matmul %40, %4, %cst_24 {dimension_numbers = #tpu.dot_dimension_numbers<[1], [0], [0], [1], [0, 0, 1, 1], [], []>} : vector<8x128xf32>, vector<128x512xf32>, vector<8x512xf32> -> vector<8x512xf32>
    %46 = arith.addf %44, %45 : vector<8x512xf32>
    %47 = vector.extract_strided_slice %46 {offsets = [0, 0], sizes = [8, 128], strides = [1, 1]} : vector<8x512xf32> to vector<8x128xf32>
    %48 = arith.negf %47 : vector<8x128xf32>
    %49 = math.exp %48 : vector<8x128xf32>
    %cst_25 = arith.constant 1.000000e+00 : f32
    %50 = vector.broadcast %cst_25 : f32 to vector<8x128xf32>
    %51 = arith.addf %50, %49 : vector<8x128xf32>
    %52 = arith.divf %50, %51 : vector<8x128xf32>
    %53 = vector.extract_strided_slice %46 {offsets = [0, 128], sizes = [8, 128], strides = [1, 1]} : vector<8x512xf32> to vector<8x128xf32>
    %54 = arith.negf %53 : vector<8x128xf32>
    %55 = math.exp %54 : vector<8x128xf32>
    %cst_26 = arith.constant 1.000000e+00 : f32
    %56 = vector.broadcast %cst_26 : f32 to vector<8x128xf32>
    %57 = arith.addf %56, %55 : vector<8x128xf32>
    %58 = arith.divf %56, %57 : vector<8x128xf32>
    %59 = vector.extract_strided_slice %46 {offsets = [0, 256], sizes = [8, 128], strides = [1, 1]} : vector<8x512xf32> to vector<8x128xf32>
    %60 = math.tanh %59 : vector<8x128xf32>
    %61 = vector.extract_strided_slice %46 {offsets = [0, 384], sizes = [8, 128], strides = [1, 1]} : vector<8x512xf32> to vector<8x128xf32>
    %62 = arith.negf %61 : vector<8x128xf32>
    %63 = math.exp %62 : vector<8x128xf32>
    %cst_27 = arith.constant 1.000000e+00 : f32
    %64 = vector.broadcast %cst_27 : f32 to vector<8x128xf32>
    %65 = arith.addf %64, %63 : vector<8x128xf32>
    %66 = arith.divf %64, %65 : vector<8x128xf32>
    %67 = arith.mulf %58, %38 : vector<8x128xf32>
    %68 = arith.mulf %52, %60 : vector<8x128xf32>
    %69 = arith.addf %67, %68 : vector<8x128xf32>
    %70 = math.tanh %69 : vector<8x128xf32>
    %71 = arith.mulf %66, %70 : vector<8x128xf32>
    %c1 = arith.constant 1 : index
    %c0_28 = arith.constant 0 : index
    %c0_29 = arith.constant 0 : index
    %72 = vector.load %arg8[%c1, %c0_28, %c0_29] : memref<8x8x128xf32, #tpu.memory_space<vmem>>, vector<1x8x128xf32>
    %73 = vector.shape_cast %72 : vector<1x8x128xf32> to vector<8x128xf32>
    %74 = vector.shape_cast %71 : vector<8x128xf32> to vector<1x8x128xf32>
    tpu.vector_store %arg8[%c1, %c0_28, %c0_29], %74 {strides = array<i32>} : memref<8x8x128xf32, #tpu.memory_space<vmem>>, vector<1x8x128xf32>,
    %c16 = arith.constant 16 : index
    %c0_30 = arith.constant 0 : index
    %75 = vector.load %arg15[%c16, %c0_30] : memref<64x512xf32, #tpu.memory_space<vmem>>, vector<8x512xf32>
    %cst_31 = arith.constant dense<0.000000e+00> : vector<8x512xf32>
    %76 = tpu.matmul %71, %4, %cst_31 {dimension_numbers = #tpu.dot_dimension_numbers<[1], [0], [0], [1], [0, 0, 1, 1], [], []>} : vector<8x128xf32>, vector<128x512xf32>, vector<8x512xf32> -> vector<8x512xf32>
    %77 = arith.addf %75, %76 : vector<8x512xf32>
    %78 = vector.extract_strided_slice %77 {offsets = [0, 0], sizes = [8, 128], strides = [1, 1]} : vector<8x512xf32> to vector<8x128xf32>
    %79 = arith.negf %78 : vector<8x128xf32>
    %80 = math.exp %79 : vector<8x128xf32>
    %cst_32 = arith.constant 1.000000e+00 : f32
    %81 = vector.broadcast %cst_32 : f32 to vector<8x128xf32>
    %82 = arith.addf %81, %80 : vector<8x128xf32>
    %83 = arith.divf %81, %82 : vector<8x128xf32>
    %84 = vector.extract_strided_slice %77 {offsets = [0, 128], sizes = [8, 128], strides = [1, 1]} : vector<8x512xf32> to vector<8x128xf32>
    %85 = arith.negf %84 : vector<8x128xf32>
    %86 = math.exp %85 : vector<8x128xf32>
    %cst_33 = arith.constant 1.000000e+00 : f32
    %87 = vector.broadcast %cst_33 : f32 to vector<8x128xf32>
    %88 = arith.addf %87, %86 : vector<8x128xf32>
    %89 = arith.divf %87, %88 : vector<8x128xf32>
    %90 = vector.extract_strided_slice %77 {offsets = [0, 256], sizes = [8, 128], strides = [1, 1]} : vector<8x512xf32> to vector<8x128xf32>
    %91 = math.tanh %90 : vector<8x128xf32>
    %92 = vector.extract_strided_slice %77 {offsets = [0, 384], sizes = [8, 128], strides = [1, 1]} : vector<8x512xf32> to vector<8x128xf32>
    %93 = arith.negf %92 : vector<8x128xf32>
    %94 = math.exp %93 : vector<8x128xf32>
    %cst_34 = arith.constant 1.000000e+00 : f32
    %95 = vector.broadcast %cst_34 : f32 to vector<8x128xf32>
    %96 = arith.addf %95, %94 : vector<8x128xf32>
    %97 = arith.divf %95, %96 : vector<8x128xf32>
    %98 = arith.mulf %89, %69 : vector<8x128xf32>
    %99 = arith.mulf %83, %91 : vector<8x128xf32>
    %100 = arith.addf %98, %99 : vector<8x128xf32>
    %101 = math.tanh %100 : vector<8x128xf32>
    %102 = arith.mulf %97, %101 : vector<8x128xf32>
    %c2 = arith.constant 2 : index
    %c0_35 = arith.constant 0 : index
    %c0_36 = arith.constant 0 : index
    %103 = vector.load %arg8[%c2, %c0_35, %c0_36] : memref<8x8x128xf32, #tpu.memory_space<vmem>>, vector<1x8x128xf32>
    %104 = vector.shape_cast %103 : vector<1x8x128xf32> to vector<8x128xf32>
    %105 = vector.shape_cast %102 : vector<8x128xf32> to vector<1x8x128xf32>
    tpu.vector_store %arg8[%c2, %c0_35, %c0_36], %105 {strides = array<i32>} : memref<8x8x128xf32, #tpu.memory_space<vmem>>, vector<1x8x128xf32>,
    %c24 = arith.constant 24 : index
    %c0_37 = arith.constant 0 : index
    %106 = vector.load %arg15[%c24, %c0_37] : memref<64x512xf32, #tpu.memory_space<vmem>>, vector<8x512xf32>
    %cst_38 = arith.constant dense<0.000000e+00> : vector<8x512xf32>
    %107 = tpu.matmul %102, %4, %cst_38 {dimension_numbers = #tpu.dot_dimension_numbers<[1], [0], [0], [1], [0, 0, 1, 1], [], []>} : vector<8x128xf32>, vector<128x512xf32>, vector<8x512xf32> -> vector<8x512xf32>
    %108 = arith.addf %106, %107 : vector<8x512xf32>
    %109 = vector.extract_strided_slice %108 {offsets = [0, 0], sizes = [8, 128], strides = [1, 1]} : vector<8x512xf32> to vector<8x128xf32>
    %110 = arith.negf %109 : vector<8x128xf32>
    %111 = math.exp %110 : vector<8x128xf32>
    %cst_39 = arith.constant 1.000000e+00 : f32
    %112 = vector.broadcast %cst_39 : f32 to vector<8x128xf32>
    %113 = arith.addf %112, %111 : vector<8x128xf32>
    %114 = arith.divf %112, %113 : vector<8x128xf32>
    %115 = vector.extract_strided_slice %108 {offsets = [0, 128], sizes = [8, 128], strides = [1, 1]} : vector<8x512xf32> to vector<8x128xf32>
    %116 = arith.negf %115 : vector<8x128xf32>
    %117 = math.exp %116 : vector<8x128xf32>
    %cst_40 = arith.constant 1.000000e+00 : f32
    %118 = vector.broadcast %cst_40 : f32 to vector<8x128xf32>
    %119 = arith.addf %118, %117 : vector<8x128xf32>
    %120 = arith.divf %118, %119 : vector<8x128xf32>
    %121 = vector.extract_strided_slice %108 {offsets = [0, 256], sizes = [8, 128], strides = [1, 1]} : vector<8x512xf32> to vector<8x128xf32>
    %122 = math.tanh %121 : vector<8x128xf32>
    %123 = vector.extract_strided_slice %108 {offsets = [0, 384], sizes = [8, 128], strides = [1, 1]} : vector<8x512xf32> to vector<8x128xf32>
    %124 = arith.negf %123 : vector<8x128xf32>
    %125 = math.exp %124 : vector<8x128xf32>
    %cst_41 = arith.constant 1.000000e+00 : f32
    %126 = vector.broadcast %cst_41 : f32 to vector<8x128xf32>
    %127 = arith.addf %126, %125 : vector<8x128xf32>
    %128 = arith.divf %126, %127 : vector<8x128xf32>
    %129 = arith.mulf %120, %100 : vector<8x128xf32>
    %130 = arith.mulf %114, %122 : vector<8x128xf32>
    %131 = arith.addf %129, %130 : vector<8x128xf32>
    %132 = math.tanh %131 : vector<8x128xf32>
    %133 = arith.mulf %128, %132 : vector<8x128xf32>
    %c3 = arith.constant 3 : index
    %c0_42 = arith.constant 0 : index
    %c0_43 = arith.constant 0 : index
    %134 = vector.load %arg8[%c3, %c0_42, %c0_43] : memref<8x8x128xf32, #tpu.memory_space<vmem>>, vector<1x8x128xf32>
    %135 = vector.shape_cast %134 : vector<1x8x128xf32> to vector<8x128xf32>
    %136 = vector.shape_cast %133 : vector<8x128xf32> to vector<1x8x128xf32>
    tpu.vector_store %arg8[%c3, %c0_42, %c0_43], %136 {strides = array<i32>} : memref<8x8x128xf32, #tpu.memory_space<vmem>>, vector<1x8x128xf32>,
    %c32 = arith.constant 32 : index
    %c0_44 = arith.constant 0 : index
    %137 = vector.load %arg15[%c32, %c0_44] : memref<64x512xf32, #tpu.memory_space<vmem>>, vector<8x512xf32>
    %cst_45 = arith.constant dense<0.000000e+00> : vector<8x512xf32>
    %138 = tpu.matmul %133, %4, %cst_45 {dimension_numbers = #tpu.dot_dimension_numbers<[1], [0], [0], [1], [0, 0, 1, 1], [], []>} : vector<8x128xf32>, vector<128x512xf32>, vector<8x512xf32> -> vector<8x512xf32>
    %139 = arith.addf %137, %138 : vector<8x512xf32>
    %140 = vector.extract_strided_slice %139 {offsets = [0, 0], sizes = [8, 128], strides = [1, 1]} : vector<8x512xf32> to vector<8x128xf32>
    %141 = arith.negf %140 : vector<8x128xf32>
    %142 = math.exp %141 : vector<8x128xf32>
    %cst_46 = arith.constant 1.000000e+00 : f32
    %143 = vector.broadcast %cst_46 : f32 to vector<8x128xf32>
    %144 = arith.addf %143, %142 : vector<8x128xf32>
    %145 = arith.divf %143, %144 : vector<8x128xf32>
    %146 = vector.extract_strided_slice %139 {offsets = [0, 128], sizes = [8, 128], strides = [1, 1]} : vector<8x512xf32> to vector<8x128xf32>
    %147 = arith.negf %146 : vector<8x128xf32>
    %148 = math.exp %147 : vector<8x128xf32>
    %cst_47 = arith.constant 1.000000e+00 : f32
    %149 = vector.broadcast %cst_47 : f32 to vector<8x128xf32>
    %150 = arith.addf %149, %148 : vector<8x128xf32>
    %151 = arith.divf %149, %150 : vector<8x128xf32>
    %152 = vector.extract_strided_slice %139 {offsets = [0, 256], sizes = [8, 128], strides = [1, 1]} : vector<8x512xf32> to vector<8x128xf32>
    %153 = math.tanh %152 : vector<8x128xf32>
    %154 = vector.extract_strided_slice %139 {offsets = [0, 384], sizes = [8, 128], strides = [1, 1]} : vector<8x512xf32> to vector<8x128xf32>
    %155 = arith.negf %154 : vector<8x128xf32>
    %156 = math.exp %155 : vector<8x128xf32>
    %cst_48 = arith.constant 1.000000e+00 : f32
    %157 = vector.broadcast %cst_48 : f32 to vector<8x128xf32>
    %158 = arith.addf %157, %156 : vector<8x128xf32>
    %159 = arith.divf %157, %158 : vector<8x128xf32>
    %160 = arith.mulf %151, %131 : vector<8x128xf32>
    %161 = arith.mulf %145, %153 : vector<8x128xf32>
    %162 = arith.addf %160, %161 : vector<8x128xf32>
    %163 = math.tanh %162 : vector<8x128xf32>
    %164 = arith.mulf %159, %163 : vector<8x128xf32>
    %c4 = arith.constant 4 : index
    %c0_49 = arith.constant 0 : index
    %c0_50 = arith.constant 0 : index
    %165 = vector.load %arg8[%c4, %c0_49, %c0_50] : memref<8x8x128xf32, #tpu.memory_space<vmem>>, vector<1x8x128xf32>
    %166 = vector.shape_cast %165 : vector<1x8x128xf32> to vector<8x128xf32>
    %167 = vector.shape_cast %164 : vector<8x128xf32> to vector<1x8x128xf32>
    tpu.vector_store %arg8[%c4, %c0_49, %c0_50], %167 {strides = array<i32>} : memref<8x8x128xf32, #tpu.memory_space<vmem>>, vector<1x8x128xf32>,
    %c40 = arith.constant 40 : index
    %c0_51 = arith.constant 0 : index
    %168 = vector.load %arg15[%c40, %c0_51] : memref<64x512xf32, #tpu.memory_space<vmem>>, vector<8x512xf32>
    %cst_52 = arith.constant dense<0.000000e+00> : vector<8x512xf32>
    %169 = tpu.matmul %164, %4, %cst_52 {dimension_numbers = #tpu.dot_dimension_numbers<[1], [0], [0], [1], [0, 0, 1, 1], [], []>} : vector<8x128xf32>, vector<128x512xf32>, vector<8x512xf32> -> vector<8x512xf32>
    %170 = arith.addf %168, %169 : vector<8x512xf32>
    %171 = vector.extract_strided_slice %170 {offsets = [0, 0], sizes = [8, 128], strides = [1, 1]} : vector<8x512xf32> to vector<8x128xf32>
    %172 = arith.negf %171 : vector<8x128xf32>
    %173 = math.exp %172 : vector<8x128xf32>
    %cst_53 = arith.constant 1.000000e+00 : f32
    %174 = vector.broadcast %cst_53 : f32 to vector<8x128xf32>
    %175 = arith.addf %174, %173 : vector<8x128xf32>
    %176 = arith.divf %174, %175 : vector<8x128xf32>
    %177 = vector.extract_strided_slice %170 {offsets = [0, 128], sizes = [8, 128], strides = [1, 1]} : vector<8x512xf32> to vector<8x128xf32>
    %178 = arith.negf %177 : vector<8x128xf32>
    %179 = math.exp %178 : vector<8x128xf32>
    %cst_54 = arith.constant 1.000000e+00 : f32
    %180 = vector.broadcast %cst_54 : f32 to vector<8x128xf32>
    %181 = arith.addf %180, %179 : vector<8x128xf32>
    %182 = arith.divf %180, %181 : vector<8x128xf32>
    %183 = vector.extract_strided_slice %170 {offsets = [0, 256], sizes = [8, 128], strides = [1, 1]} : vector<8x512xf32> to vector<8x128xf32>
    %184 = math.tanh %183 : vector<8x128xf32>
    %185 = vector.extract_strided_slice %170 {offsets = [0, 384], sizes = [8, 128], strides = [1, 1]} : vector<8x512xf32> to vector<8x128xf32>
    %186 = arith.negf %185 : vector<8x128xf32>
    %187 = math.exp %186 : vector<8x128xf32>
    %cst_55 = arith.constant 1.000000e+00 : f32
    %188 = vector.broadcast %cst_55 : f32 to vector<8x128xf32>
    %189 = arith.addf %188, %187 : vector<8x128xf32>
    %190 = arith.divf %188, %189 : vector<8x128xf32>
    %191 = arith.mulf %182, %162 : vector<8x128xf32>
    %192 = arith.mulf %176, %184 : vector<8x128xf32>
    %193 = arith.addf %191, %192 : vector<8x128xf32>
    %194 = math.tanh %193 : vector<8x128xf32>
    %195 = arith.mulf %190, %194 : vector<8x128xf32>
    %c5 = arith.constant 5 : index
    %c0_56 = arith.constant 0 : index
    %c0_57 = arith.constant 0 : index
    %196 = vector.load %arg8[%c5, %c0_56, %c0_57] : memref<8x8x128xf32, #tpu.memory_space<vmem>>, vector<1x8x128xf32>
    %197 = vector.shape_cast %196 : vector<1x8x128xf32> to vector<8x128xf32>
    %198 = vector.shape_cast %195 : vector<8x128xf32> to vector<1x8x128xf32>
    tpu.vector_store %arg8[%c5, %c0_56, %c0_57], %198 {strides = array<i32>} : memref<8x8x128xf32, #tpu.memory_space<vmem>>, vector<1x8x128xf32>,
    %c48 = arith.constant 48 : index
    %c0_58 = arith.constant 0 : index
    %199 = vector.load %arg15[%c48, %c0_58] : memref<64x512xf32, #tpu.memory_space<vmem>>, vector<8x512xf32>
    %cst_59 = arith.constant dense<0.000000e+00> : vector<8x512xf32>
    %200 = tpu.matmul %195, %4, %cst_59 {dimension_numbers = #tpu.dot_dimension_numbers<[1], [0], [0], [1], [0, 0, 1, 1], [], []>} : vector<8x128xf32>, vector<128x512xf32>, vector<8x512xf32> -> vector<8x512xf32>
    %201 = arith.addf %199, %200 : vector<8x512xf32>
    %202 = vector.extract_strided_slice %201 {offsets = [0, 0], sizes = [8, 128], strides = [1, 1]} : vector<8x512xf32> to vector<8x128xf32>
    %203 = arith.negf %202 : vector<8x128xf32>
    %204 = math.exp %203 : vector<8x128xf32>
    %cst_60 = arith.constant 1.000000e+00 : f32
    %205 = vector.broadcast %cst_60 : f32 to vector<8x128xf32>
    %206 = arith.addf %205, %204 : vector<8x128xf32>
    %207 = arith.divf %205, %206 : vector<8x128xf32>
    %208 = vector.extract_strided_slice %201 {offsets = [0, 128], sizes = [8, 128], strides = [1, 1]} : vector<8x512xf32> to vector<8x128xf32>
    %209 = arith.negf %208 : vector<8x128xf32>
    %210 = math.exp %209 : vector<8x128xf32>
    %cst_61 = arith.constant 1.000000e+00 : f32
    %211 = vector.broadcast %cst_61 : f32 to vector<8x128xf32>
    %212 = arith.addf %211, %210 : vector<8x128xf32>
    %213 = arith.divf %211, %212 : vector<8x128xf32>
    %214 = vector.extract_strided_slice %201 {offsets = [0, 256], sizes = [8, 128], strides = [1, 1]} : vector<8x512xf32> to vector<8x128xf32>
    %215 = math.tanh %214 : vector<8x128xf32>
    %216 = vector.extract_strided_slice %201 {offsets = [0, 384], sizes = [8, 128], strides = [1, 1]} : vector<8x512xf32> to vector<8x128xf32>
    %217 = arith.negf %216 : vector<8x128xf32>
    %218 = math.exp %217 : vector<8x128xf32>
    %cst_62 = arith.constant 1.000000e+00 : f32
    %219 = vector.broadcast %cst_62 : f32 to vector<8x128xf32>
    %220 = arith.addf %219, %218 : vector<8x128xf32>
    %221 = arith.divf %219, %220 : vector<8x128xf32>
    %222 = arith.mulf %213, %193 : vector<8x128xf32>
    %223 = arith.mulf %207, %215 : vector<8x128xf32>
    %224 = arith.addf %222, %223 : vector<8x128xf32>
    %225 = math.tanh %224 : vector<8x128xf32>
    %226 = arith.mulf %221, %225 : vector<8x128xf32>
    %c6 = arith.constant 6 : index
    %c0_63 = arith.constant 0 : index
    %c0_64 = arith.constant 0 : index
    %227 = vector.load %arg8[%c6, %c0_63, %c0_64] : memref<8x8x128xf32, #tpu.memory_space<vmem>>, vector<1x8x128xf32>
    %228 = vector.shape_cast %227 : vector<1x8x128xf32> to vector<8x128xf32>
    %229 = vector.shape_cast %226 : vector<8x128xf32> to vector<1x8x128xf32>
    tpu.vector_store %arg8[%c6, %c0_63, %c0_64], %229 {strides = array<i32>} : memref<8x8x128xf32, #tpu.memory_space<vmem>>, vector<1x8x128xf32>,
    %c56 = arith.constant 56 : index
    %c0_65 = arith.constant 0 : index
    %230 = vector.load %arg15[%c56, %c0_65] : memref<64x512xf32, #tpu.memory_space<vmem>>, vector<8x512xf32>
    %cst_66 = arith.constant dense<0.000000e+00> : vector<8x512xf32>
    %231 = tpu.matmul %226, %4, %cst_66 {dimension_numbers = #tpu.dot_dimension_numbers<[1], [0], [0], [1], [0, 0, 1, 1], [], []>} : vector<8x128xf32>, vector<128x512xf32>, vector<8x512xf32> -> vector<8x512xf32>
    %232 = arith.addf %230, %231 : vector<8x512xf32>
    %233 = vector.extract_strided_slice %232 {offsets = [0, 0], sizes = [8, 128], strides = [1, 1]} : vector<8x512xf32> to vector<8x128xf32>
    %234 = arith.negf %233 : vector<8x128xf32>
    %235 = math.exp %234 : vector<8x128xf32>
    %cst_67 = arith.constant 1.000000e+00 : f32
    %236 = vector.broadcast %cst_67 : f32 to vector<8x128xf32>
    %237 = arith.addf %236, %235 : vector<8x128xf32>
    %238 = arith.divf %236, %237 : vector<8x128xf32>
    %239 = vector.extract_strided_slice %232 {offsets = [0, 128], sizes = [8, 128], strides = [1, 1]} : vector<8x512xf32> to vector<8x128xf32>
    %240 = arith.negf %239 : vector<8x128xf32>
    %241 = math.exp %240 : vector<8x128xf32>
    %cst_68 = arith.constant 1.000000e+00 : f32
    %242 = vector.broadcast %cst_68 : f32 to vector<8x128xf32>
    %243 = arith.addf %242, %241 : vector<8x128xf32>
    %244 = arith.divf %242, %243 : vector<8x128xf32>
    %245 = vector.extract_strided_slice %232 {offsets = [0, 256], sizes = [8, 128], strides = [1, 1]} : vector<8x512xf32> to vector<8x128xf32>
    %246 = math.tanh %245 : vector<8x128xf32>
    %247 = vector.extract_strided_slice %232 {offsets = [0, 384], sizes = [8, 128], strides = [1, 1]} : vector<8x512xf32> to vector<8x128xf32>
    %248 = arith.negf %247 : vector<8x128xf32>
    %249 = math.exp %248 : vector<8x128xf32>
    %cst_69 = arith.constant 1.000000e+00 : f32
    %250 = vector.broadcast %cst_69 : f32 to vector<8x128xf32>
    %251 = arith.addf %250, %249 : vector<8x128xf32>
    %252 = arith.divf %250, %251 : vector<8x128xf32>
    %253 = arith.mulf %244, %224 : vector<8x128xf32>
    %254 = arith.mulf %238, %246 : vector<8x128xf32>
    %255 = arith.addf %253, %254 : vector<8x128xf32>
    %256 = math.tanh %255 : vector<8x128xf32>
    %257 = arith.mulf %252, %256 : vector<8x128xf32>
    %c7 = arith.constant 7 : index
    %c0_70 = arith.constant 0 : index
    %c0_71 = arith.constant 0 : index
    %258 = vector.load %arg8[%c7, %c0_70, %c0_71] : memref<8x8x128xf32, #tpu.memory_space<vmem>>, vector<1x8x128xf32>
    %259 = vector.shape_cast %258 : vector<1x8x128xf32> to vector<8x128xf32>
    %260 = vector.shape_cast %257 : vector<8x128xf32> to vector<1x8x128xf32>
    tpu.vector_store %arg8[%c7, %c0_70, %c0_71], %260 {strides = array<i32>} : memref<8x8x128xf32, #tpu.memory_space<vmem>>, vector<1x8x128xf32>,
    %c0_72 = arith.constant 0 : index
    %c0_73 = arith.constant 0 : index
    %261 = vector.load %arg13[%c0_72, %c0_73] : memref<8x128xf32, #tpu.memory_space<vmem>>, vector<8x128xf32>
    tpu.vector_store %arg13[%c0_72, %c0_73], %257 {strides = array<i32>} : memref<8x128xf32, #tpu.memory_space<vmem>>, vector<8x128xf32>,
    %c0_74 = arith.constant 0 : index
    %c0_75 = arith.constant 0 : index
    %262 = vector.load %arg14[%c0_74, %c0_75] : memref<8x128xf32, #tpu.memory_space<vmem>>, vector<8x128xf32>
    tpu.vector_store %arg14[%c0_74, %c0_75], %255 {strides = array<i32>} : memref<8x128xf32, #tpu.memory_space<vmem>>, vector<8x128xf32>,
    %c0_i32_76 = arith.constant 0 : i32
    %263 = arith.cmpi eq, %arg1, %c0_i32_76 : i32
    %264 = arith.extui %263 : i1 to i32
    %c0_i32_77 = arith.constant 0 : i32
    %265 = arith.cmpi ne, %264, %c0_i32_77 : i32
    scf.if %265 {
      %c0_78 = arith.constant 0 : index
      %c0_79 = arith.constant 0 : index
      %266 = vector.load %arg9[%c0_78, %c0_79] : memref<8x128xf32, #tpu.memory_space<vmem>>, vector<8x128xf32>
      tpu.vector_store %arg9[%c0_78, %c0_79], %257 {strides = array<i32>} : memref<8x128xf32, #tpu.memory_space<vmem>>, vector<8x128xf32>,
      %c0_80 = arith.constant 0 : index
      %c0_81 = arith.constant 0 : index
      %267 = vector.load %arg10[%c0_80, %c0_81] : memref<8x128xf32, #tpu.memory_space<vmem>>, vector<8x128xf32>
      tpu.vector_store %arg10[%c0_80, %c0_81], %255 {strides = array<i32>} : memref<8x128xf32, #tpu.memory_space<vmem>>, vector<8x128xf32>,
    } else {
    }
    return
  }
  func.func @transform_0(%arg0: i32, %arg1: i32) -> (i32, i32) {
    %c0_i32 = arith.constant 0 : i32
    %c0_i32_0 = arith.constant 0 : i32
    return %arg1, %c0_i32 : i32, i32
  }
  func.func @transform_3(%arg0: i32, %arg1: i32) -> (i32, i32) {
    %c0_i32 = arith.constant 0 : i32
    %c0_i32_0 = arith.constant 0 : i32
    %c0_i32_1 = arith.constant 0 : i32
    return %c0_i32, %c0_i32_0 : i32, i32
  }
  func.func @transform_4(%arg0: i32, %arg1: i32) -> (i32, i32) {
    %c0_i32 = arith.constant 0 : i32
    %c0_i32_0 = arith.constant 0 : i32
    return %arg0, %c0_i32 : i32, i32
  }
  func.func @transform_5(%arg0: i32, %arg1: i32) -> (i32, i32) {
    %c0_i32 = arith.constant 0 : i32
    %c0_i32_0 = arith.constant 0 : i32
    return %arg0, %c0_i32 : i32, i32
  }
  func.func @transform_6(%arg0: i32, %arg1: i32) -> (i32, i32, i32) {
    %c0_i32 = arith.constant 0 : i32
    %c0_i32_0 = arith.constant 0 : i32
    return %arg1, %arg0, %c0_i32 : i32, i32, i32
  }
  func.func @transform_7(%arg0: i32, %arg1: i32) -> (i32, i32) {
    %c0_i32 = arith.constant 0 : i32
    %c0_i32_0 = arith.constant 0 : i32
    return %arg0, %c0_i32 : i32, i32
  }
  func.func @transform_8(%arg0: i32, %arg1: i32) -> (i32, i32) {
    %c0_i32 = arith.constant 0 : i32
    %c0_i32_0 = arith.constant 0 : i32
    return %arg0, %c0_i32 : i32, i32
  }
}

</mosaic_0001>

<bundles_post_ra>
// kernel: tpu_custom_call.1
= control target key start
LH: loop header
LB: loop body
LE: loop exit
PB: predicated region body
PF: predicated region fallthrough
CT: control target
= control target key end

     0   :  { %14 = vsyncpa [#allocation9], 0  ;;  %s3528_s0 = inlined_call_operand.hbm [shape: f32[64,128], index: 0, kind: input, shape index: {}]   ;;  %s3529_s1 = inlined_call_operand.hbm [shape: f32[128,512], index: 1, kind: input, shape index: {}]   ;;  %s3530_s2 = inlined_call_operand.hbm [shape: f32[128,512], index: 2, kind: input, shape index: {}]   ;;  %s3531_s3 = inlined_call_operand.hbm [shape: f32[1,512], index: 3, kind: input, shape index: {}]   ;;  %s3532_s4 = inlined_call_operand.vmem [shape: f32[8,128], index: 4, kind: input, shape index: {}]   ;;  %s3533_s5 = inlined_call_operand.vmem [shape: f32[8,128], index: 5, kind: input, shape index: {}]   ;;  %s3534_s6 = inlined_call_operand.hbm [shape: f32[8,8,128], index: 6, kind: output, shape index: {0}]   ;;  %s3535_s7 = inlined_call_operand.hbm [shape: f32[8,128], index: 7, kind: output, shape index: {1}]   ;;  %s3536_s8 = inlined_call_operand.hbm [shape: f32[8,128], index: 8, kind: output, shape index: {2}]  }
   0x1   :  { %15 = vsyncpa [#allocation12], 0 }
   0x2   :  { %16 = vsyncpa [#allocation10], 0 }
   0x3   :  { %17 = vsyncpa [#allocation15], 0  ;;  %s2947_s27 = smov [#allocation8]   ;;  %s2781_s9 = scalar_lea.hbm %s3528_s0, 1024 }
   0x4   :  { %s23_s28 = sshll.u32 %s2947_s27, 4  ;;  %p2782_p0 = scmp.ne.s32.totalorder %s3528_s0, %s2781_s9  ;;  %s24_s28 = int_to_ptr.vmem [resolvable:$true] %s23_s28 }
   0x5   :  { %p2785_p1 = scmp.lt.u32.totalorder %s2781_s9, %s3528_s0 }
   0x7   :  { %p2787_p2 = pnand %p2785_p1, %p2782_p0 }
   0x9   :  { %2790 = shalt.err (!%p2787_p2)
}
   0xa   :  { %s2791_s14 = scalar_lea.vmem %s24_s28, 1024  ;;  %p2796_p4 = scmp.lt.s32.totalorder %s24_s28, %s24_s28 }
   0xb   :  { %p2792_p3 = scmp.ne.s32.totalorder %s24_s28, %s2791_s14  ;;  %p2797_p5 = scmp.lt.s32.totalorder %s2791_s14, %s2791_s14 }
   0xd   :  { %p2798_p6 = por %p2797_p5, %p2796_p4 }
   0xf   :  { %p2799_p7 = pnand %p2798_p6, %p2792_p3 }
  0x11   :  { %2802 = shalt.err (!%p2799_p7)
}
  0x12   :  { %s2948_s15 = smov 128   ;;  %s2949_s16 = smov 8  }
  0x13   :  { %29 = dma.hbm_to_vmem [thread:$0]  %s3528_s0, 1024, %s24_s28, [#allocation9], %s2948_s15, %s2948_s15, %s2949_s16  }
  0x14   :  { %s2950_s19 = smov [#allocation11]   ;;  %s2803_s23 = scalar_lea.hbm %s3531_s3, 64 }
  0x15   :  { %s36_s20 = sshll.u32 %s2950_s19, 4  ;;  %p2804_p8 = scmp.ne.s32.totalorder %s3531_s3, %s2803_s23  ;;  %s37_s20 = int_to_ptr.vmem [resolvable:$true] %s36_s20 }
  0x16   :  { %p2807_p9 = scmp.lt.u32.totalorder %s2803_s23, %s3531_s3 }
  0x18   :  { %p2809_p10 = pnand %p2807_p9, %p2804_p8 }
  0x1a   :  { %2812 = shalt.err (!%p2809_p10)
}
  0x1b   :  { %s2813_s29 = scalar_lea.vmem %s37_s20, 64  ;;  %p2818_p12 = scmp.lt.s32.totalorder %s37_s20, %s37_s20 }
  0x1c   :  { %p2814_p11 = scmp.ne.s32.totalorder %s37_s20, %s2813_s29  ;;  %p2819_p13 = scmp.lt.s32.totalorder %s2813_s29, %s2813_s29 }
  0x1e   :  { %p2820_p0 = por %p2819_p13, %p2818_p12 }
  0x20   :  { %p2821_p1 = pnand %p2820_p0, %p2814_p11 }
  0x22   :  { %2824 = shalt.err (!%p2821_p1)
}
  0x23   :  { %39 = dma.hbm_to_vmem [thread:$0]  %s3531_s3, 64, %s37_s20, [#allocation12]  }
  0x24   :  { %2935 = dma.done.wait [#allocation9], 1024  }
  0x25   :  { %2936 = vsyncadd [#allocation9], 4294966272 }
  0x26   :  { %2937 = dma.done.wait [#allocation12], 64  }
  0x27   :  { %2938 = vsyncadd [#allocation12], 4294967232  ;;  %s2951_s30 = smov [#allocation2]   ;;  %s2952_s10 = smov [#allocation3]  }
  0x28   :  { %s61_s9 = sshll.u32 %s2951_s30, 4  ;;  %s73_s11 = sshll.u32 %s2952_s10, 4  ;;  %s62_s9 = int_to_ptr.vmem [resolvable:$true] %s61_s9  ;;  %s74_s11 = int_to_ptr.vmem [resolvable:$true] %s73_s11 }
  0x29   :  { %s2825_s14 = scalar_lea.hbm %s3529_s1, 8192 }
  0x2a   :  { %p2826_p2 = scmp.ne.s32.totalorder %s3529_s1, %s2825_s14  ;;  %p2829_p3 = scmp.lt.u32.totalorder %s2825_s14, %s3529_s1 }
  0x2c   :  { %p2831_p4 = pnand %p2829_p3, %p2826_p2 }
  0x2e   :  { %2834 = shalt.err (!%p2831_p4)  }
  0x2f   :  { %s2835_s20 = scalar_lea.vmem %s62_s9, 8192  ;;  %p2840_p6 = scmp.lt.s32.totalorder %s62_s9, %s62_s9 }
  0x30   :  { %p2836_p5 = scmp.ne.s32.totalorder %s62_s9, %s2835_s20  ;;  %p2841_p7 = scmp.lt.s32.totalorder %s2835_s20, %s2835_s20 }
  0x32   :  { %p2842_p8 = por %p2841_p7, %p2840_p6 }
  0x34   :  { %p2843_p9 = pnand %p2842_p8, %p2836_p5 }
  0x36   :  { %2846 = shalt.err (!%p2843_p9)  }
  0x37   :  { %64 = dma.hbm_to_vmem [thread:$0]  %s3529_s1, 8192, %s62_s9, [#allocation7] }
  0x38   :  { %s2847_s25 = scalar_lea.hbm %s3530_s2, 8192 }
  0x39   :  { %p2848_p10 = scmp.ne.s32.totalorder %s3530_s2, %s2847_s25  ;;  %p2851_p11 = scmp.lt.u32.totalorder %s2847_s25, %s3530_s2 }
  0x3b   :  { %p2853_p12 = pnand %p2851_p11, %p2848_p10 }
  0x3d   :  { %2856 = shalt.err (!%p2853_p12)  }
  0x3e   :  { %s2857_s28 = scalar_lea.vmem %s74_s11, 8192  ;;  %p2862_p0 = scmp.lt.s32.totalorder %s74_s11, %s74_s11 }
  0x3f   :  { %p2858_p13 = scmp.ne.s32.totalorder %s74_s11, %s2857_s28  ;;  %p2863_p1 = scmp.lt.s32.totalorder %s2857_s28, %s2857_s28 }
  0x41   :  { %p2864_p2 = por %p2863_p1, %p2862_p0 }
  0x43   :  { %p2865_p3 = pnand %p2864_p2, %p2858_p13 }
  0x45   :  { %2868 = shalt.err (!%p2865_p3)  }
  0x46   :  { %76 = dma.hbm_to_vmem [thread:$0]  %s3530_s2, 8192, %s74_s11, [#allocation7 + $0x1] }
  0x47   :  { %2939 = dma.done.wait [#allocation7], 8192 }
  0x48   :  { %2940 = vsyncadd [#allocation7], 4294959104 }
  0x49   :  { %2941 = dma.done.wait [#allocation7 + $0x1], 8192 }
  0x4a   :  { %2942 = vsyncadd [#allocation7 + $0x1], 4294959104  ;;  %v2953_v0 = vmov 0.0   ;;  %v88_v1 = vld [vmem:[#allocation2 + $0x8] sm:$0xff]  ;;  %v90_v3 = vld [vmem:[#allocation2 + $0x18] sm:$0xff]  ;;  %s2955_s12 = smov [#allocation13]  }
  0x4b   :  { %309 = vmatprep.mubr.f32.mxu0 %v2953_v0  ;;  %422 = vmatprep.mubr.f32.mxu1 %v2953_v0  ;;  %v92_v2 = vld [vmem:[#allocation2 + $0x28] sm:$0xff]  ;;  %v94_v5 = vld [vmem:[#allocation2 + $0x38] sm:$0xff]  ;;  %v87_v6 = vld [vmem:[#allocation2] sm:$0xff]  ;;  %s1924_s13 = sshll.u32 %s2955_s12, 4  ;;  %s2956_s14 = smov [#allocation16]   ;;  %s3475_s13 = int_to_ptr.vmem [resolvable:$true] %s1924_s13 }
  0x4c   :  { %v2003_v4 = vpack.c.bf16 %v92_v2, %v88_v1  ;;  %v91_v7 = vld [vmem:[#allocation2 + $0x20] sm:$0xff]  ;;  %v2035_v8 = vpack.c.bf16 %v94_v5, %v90_v3  ;;  %v89_v10 = vld [vmem:[#allocation2 + $0x10] sm:$0xff]  ;;  %v96_v12 = vld [vmem:[#allocation2 + $0x48] sm:$0xff]  ;;  %s1947_s17 = sshll.u32 %s2956_s14, 4  ;;  %s3477_s17 = int_to_ptr.vmem [resolvable:$true] %s1947_s17 }
  0x4d   :  { %v2005_v9 = vpack.c.bf16 %v91_v7, %v87_v6  ;;  %v93_v11 = vld [vmem:[#allocation2 + $0x30] sm:$0xff]  ;;  %v100_v14 = vld [vmem:[#allocation2 + $0x68] sm:$0xff]  ;;  %v98_v15 = vld [vmem:[#allocation2 + $0x58] sm:$0xff] }
  0x4e   :  { %2004 = vmatprep.subr.bf16.mxu0 %v2003_v4  ;;  %v2037_v13 = vpack.c.bf16 %v93_v11, %v89_v10  ;;  %v102_v16 = vld [vmem:[#allocation2 + $0x78] sm:$0xff]  ;;  %2036 = vmatprep.subr.bf16.mxu1 %v2035_v8  ;;  %v2007_v17 = vpack.c.bf16 %v100_v14, %v96_v12  ;;  %v95_v19 = vld [vmem:[#allocation2 + $0x40] sm:$0xff]  ;;  %v97_v21 = vld [vmem:[#allocation2 + $0x50] sm:$0xff] }
  0x4f   :  { %2006 = vmatpush1.bf16.msra.mxu0 %v2005_v9  ;;  %v2039_v18 = vpack.c.bf16 %v102_v16, %v98_v15  ;;  %v99_v20 = vld [vmem:[#allocation2 + $0x60] sm:$0xff]  ;;  %v101_v23 = vld [vmem:[#allocation2 + $0x70] sm:$0xff]  ;;  %v104_v24 = vld [vmem:[#allocation2 + $0x88] sm:$0xff] }
  0x50   :  { %2038 = vmatpush1.bf16.msra.mxu1 %v2037_v13  ;;  %v2009_v22 = vpack.c.bf16 %v99_v20, %v95_v19  ;;  %v108_v25 = vld [vmem:[#allocation2 + $0xa8] sm:$0xff]  ;;  %2008 = vmatprep.subr.bf16.mxu0 %v2007_v17  ;;  %v2041_v26 = vpack.c.bf16 %v101_v23, %v97_v21  ;;  %v106_v28 = vld [vmem:[#allocation2 + $0x98] sm:$0xff]  ;;  %v103_v30 = vld [vmem:[#allocation2 + $0x80] sm:$0xff] }
  0x51   :  { %2040 = vmatprep.subr.bf16.mxu1 %v2039_v18  ;;  %v2011_v27 = vpack.c.bf16 %v108_v25, %v104_v24  ;;  %v110_v29 = vld [vmem:[#allocation2 + $0xb8] sm:$0xff]  ;;  %v107_v32 = vld [vmem:[#allocation2 + $0xa0] sm:$0xff]  ;;  %v105_v33 = vld [vmem:[#allocation2 + $0x90] sm:$0xff] }
  0x52   :  { %v2043_v31 = vpack.c.bf16 %v110_v29, %v106_v28  ;;  %v109_v34 = vld [vmem:[#allocation2 + $0xb0] sm:$0xff]  ;;  %v2013_v35 = vpack.c.bf16 %v107_v32, %v103_v30  ;;  %v112_v36 = vld [vmem:[#allocation2 + $0xc8] sm:$0xff]  ;;  %v114_v38 = vld [vmem:[#allocation2 + $0xd8] sm:$0xff] }
  0x53   :  { %2010 = vmatpush1.bf16.msra.mxu0 %v2009_v22  ;;  %v116_v37 = vld [vmem:[#allocation2 + $0xe8] sm:$0xff]  ;;  %v2045_v39 = vpack.c.bf16 %v109_v34, %v105_v33  ;;  %v118_v41 = vld [vmem:[#allocation2 + $0xf8] sm:$0xff]  ;;  %v111_v42 = vld [vmem:[#allocation2 + $0xc0] sm:$0xff] }
  0x54   :  { %2042 = vmatpush1.bf16.msra.mxu1 %v2041_v26  ;;  %2012 = vmatprep.subr.bf16.mxu0 %v2011_v27  ;;  %v2015_v40 = vpack.c.bf16 %v116_v37, %v112_v36  ;;  %v115_v43 = vld [vmem:[#allocation2 + $0xe0] sm:$0xff]  ;;  %v2047_v44 = vpack.c.bf16 %v118_v41, %v114_v38  ;;  %v113_v45 = vld [vmem:[#allocation2 + $0xd0] sm:$0xff]  ;;  %v120_v47 = vld [vmem:[#allocation2 + $0x108] sm:$0xff] }
  0x55   :  { %2044 = vmatprep.subr.bf16.mxu1 %v2043_v31  ;;  %v117_v46 = vld [vmem:[#allocation2 + $0xf0] sm:$0xff]  ;;  %v124_v48 = vld [vmem:[#allocation2 + $0x128] sm:$0xff]  ;;  %v122_v49 = vld [vmem:[#allocation2 + $0x118] sm:$0xff]  ;;  %v2017_v51 = vpack.c.bf16 %v115_v43, %v111_v42 }
  0x56   :  { %v126_v50 = vld [vmem:[#allocation2 + $0x138] sm:$0xff]  ;;  %v2049_v52 = vpack.c.bf16 %v117_v46, %v113_v45  ;;  %v2019_v53 = vpack.c.bf16 %v124_v48, %v120_v47  ;;  %v119_v54 = vld [vmem:[#allocation2 + $0x100] sm:$0xff]  ;;  %v121_v56 = vld [vmem:[#allocation2 + $0x110] sm:$0xff] }
  0x57   :  { %2014 = vmatpush1.bf16.msra.mxu0 %v2013_v35  ;;  %v123_v55 = vld [vmem:[#allocation2 + $0x120] sm:$0xff]  ;;  %v2051_v57 = vpack.c.bf16 %v126_v50, %v122_v49  ;;  %v125_v58 = vld [vmem:[#allocation2 + $0x130] sm:$0xff]  ;;  %v128_v59 = vld [vmem:[#allocation2 + $0x148] sm:$0xff] }
  0x58   :  { %2046 = vmatpush1.bf16.msra.mxu1 %v2045_v39  ;;  %2016 = vmatprep.subr.bf16.mxu0 %v2015_v40  ;;  %v132_v60 = vld [vmem:[#allocation2 + $0x168] sm:$0xff]  ;;  %v130_v61 = vld [vmem:[#allocation2 + $0x158] sm:$0xff]  ;;  %v2021_v63 = vpack.c.bf16 %v123_v55, %v119_v54  ;;  %v2053_v1 = vpack.c.bf16 %v125_v58, %v121_v56  ;;  %v127_v3 = vld [vmem:[#allocation2 + $0x140] sm:$0xff] }
  0x59   :  { %2048 = vmatprep.subr.bf16.mxu1 %v2047_v44  ;;  %v134_v62 = vld [vmem:[#allocation2 + $0x178] sm:$0xff]  ;;  %v2023_v2 = vpack.c.bf16 %v132_v60, %v128_v59  ;;  %v131_v4 = vld [vmem:[#allocation2 + $0x160] sm:$0xff]  ;;  %v129_v5 = vld [vmem:[#allocation2 + $0x150] sm:$0xff] }
  0x5a   :  { %v2055_v6 = vpack.c.bf16 %v134_v62, %v130_v61  ;;  %v133_v7 = vld [vmem:[#allocation2 + $0x170] sm:$0xff]  ;;  %v136_v8 = vld [vmem:[#allocation2 + $0x188] sm:$0xff]  ;;  %v138_v10 = vld [vmem:[#allocation2 + $0x198] sm:$0xff]  ;;  %v2025_v12 = vpack.c.bf16 %v131_v4, %v127_v3 }
  0x5b   :  { %2018 = vmatpush1.bf16.msra.mxu0 %v2017_v51  ;;  %v140_v9 = vld [vmem:[#allocation2 + $0x1a8] sm:$0xff]  ;;  %v142_v11 = vld [vmem:[#allocation2 + $0x1b8] sm:$0xff]  ;;  %v2057_v13 = vpack.c.bf16 %v133_v7, %v129_v5  ;;  %v135_v15 = vld [vmem:[#allocation2 + $0x180] sm:$0xff] }
  0x5c   :  { %2050 = vmatpush1.bf16.msra.mxu1 %v2049_v52  ;;  %2020 = vmatprep.subr.bf16.mxu0 %v2019_v53  ;;  %v2027_v14 = vpack.c.bf16 %v140_v9, %v136_v8  ;;  %v139_v16 = vld [vmem:[#allocation2 + $0x1a0] sm:$0xff]  ;;  %v137_v17 = vld [vmem:[#allocation2 + $0x190] sm:$0xff]  ;;  %v2059_v18 = vpack.c.bf16 %v142_v11, %v138_v10  ;;  %v144_v20 = vld [vmem:[#allocation2 + $0x1c8] sm:$0xff] }
  0x5d   :  { %2052 = vmatprep.subr.bf16.mxu1 %v2051_v57  ;;  %v141_v19 = vld [vmem:[#allocation2 + $0x1b0] sm:$0xff]  ;;  %v148_v21 = vld [vmem:[#allocation2 + $0x1e8] sm:$0xff]  ;;  %v146_v22 = vld [vmem:[#allocation2 + $0x1d8] sm:$0xff]  ;;  %v2029_v24 = vpack.c.bf16 %v139_v16, %v135_v15 }
  0x5e   :  { %v150_v23 = vld [vmem:[#allocation2 + $0x1f8] sm:$0xff]  ;;  %v2061_v25 = vpack.c.bf16 %v141_v19, %v137_v17  ;;  %v2031_v26 = vpack.c.bf16 %v148_v21, %v144_v20  ;;  %v143_v27 = vld [vmem:[#allocation2 + $0x1c0] sm:$0xff]  ;;  %v145_v29 = vld [vmem:[#allocation2 + $0x1d0] sm:$0xff] }
  0x5f   :  { %2022 = vmatpush1.bf16.msra.mxu0 %v2021_v63  ;;  %v147_v28 = vld [vmem:[#allocation2 + $0x1e0] sm:$0xff]  ;;  %v2063_v30 = vpack.c.bf16 %v150_v23, %v146_v22  ;;  %v149_v31 = vld [vmem:[#allocation2 + $0x1f0] sm:$0xff]  ;;  %v152_v32 = vld [vmem:[#allocation3 + $0x8] sm:$0xff] }
  0x60   :  { %2054 = vmatpush1.bf16.msra.mxu1 %v2053_v1  ;;  %2024 = vmatprep.subr.bf16.mxu0 %v2023_v2  ;;  %v156_v33 = vld [vmem:[#allocation3 + $0x28] sm:$0xff]  ;;  %v154_v34 = vld [vmem:[#allocation3 + $0x18] sm:$0xff]  ;;  %v2033_v36 = vpack.c.bf16 %v147_v28, %v143_v27  ;;  %v2065_v37 = vpack.c.bf16 %v149_v31, %v145_v29  ;;  %v151_v39 = vld [vmem:[#allocation3] sm:$0xff] }
  0x61   :  { %2056 = vmatprep.subr.bf16.mxu1 %v2055_v6  ;;  %v158_v35 = vld [vmem:[#allocation3 + $0x38] sm:$0xff]  ;;  %v3055_v38 = vpack.c.bf16 %v156_v33, %v152_v32  ;;  %v155_v40 = vld [vmem:[#allocation3 + $0x20] sm:$0xff]  ;;  %v153_v42 = vld [vmem:[#allocation3 + $0x10] sm:$0xff] }
  0x62   :  { %v3057_v41 = vpack.c.bf16 %v158_v35, %v154_v34  ;;  %v157_v43 = vld [vmem:[#allocation3 + $0x30] sm:$0xff]  ;;  %v160_v44 = vld [vmem:[#allocation3 + $0x48] sm:$0xff]  ;;  %v215_v46 = vld [vmem:[#allocation8] sm:$0xff]  ;;  %v3059_v47 = vpack.c.bf16 %v155_v40, %v151_v39 }
  0x63   :  { %2026 = vmatpush1.bf16.msra.mxu0 %v2025_v12  ;;  %v164_v45 = vld [vmem:[#allocation3 + $0x68] sm:$0xff]  ;;  %v162_v48 = vld [vmem:[#allocation3 + $0x58] sm:$0xff]  ;;  %v3062_v50 = vpack.c.bf16 %v157_v43, %v153_v42  ;;  %v159_v51 = vld [vmem:[#allocation3 + $0x40] sm:$0xff] }
  0x64   :  { %2058 = vmatpush1.bf16.msra.mxu1 %v2057_v13  ;;  %2028 = vmatprep.subr.bf16.mxu0 %v2027_v14  ;;  %v166_v49 = vld [vmem:[#allocation3 + $0x78] sm:$0xff]  ;;  %v163_v52 = vld [vmem:[#allocation3 + $0x60] sm:$0xff]  ;;  %v3065_v53 = vpack.c.bf16 %v164_v45, %v160_v44  ;;  %v161_v54 = vld [vmem:[#allocation3 + $0x50] sm:$0xff] }
  0x65   :  { %2060 = vmatprep.subr.bf16.mxu1 %v2059_v18  ;;  %v165_v55 = vld [vmem:[#allocation3 + $0x70] sm:$0xff]  ;;  %v3067_v56 = vpack.c.bf16 %v166_v49, %v162_v48  ;;  %v168_v57 = vld [vmem:[#allocation3 + $0x88] sm:$0xff]  ;;  %v3070_v60 = vpack.c.bf16 %v163_v52, %v159_v51  ;;  %v170_v61 = vld [vmem:[#allocation3 + $0x98] sm:$0xff] }
  0x66   :  { %v172_v58 = vld [vmem:[#allocation3 + $0xa8] sm:$0xff]  ;;  %v174_v62 = vld [vmem:[#allocation3 + $0xb8] sm:$0xff]  ;;  %v3074_v63 = vpack.c.bf16 %v165_v55, %v161_v54  ;;  %v167_v1 = vld [vmem:[#allocation3 + $0x80] sm:$0xff] }
  0x67   :  { %2030 = vmatpush1.bf16.msra.mxu0 %v2029_v24  ;;  %v216_v59 = vld [vmem:[#allocation8 + $0x8] sm:$0xff]  ;;  %v171_v2 = vld [vmem:[#allocation3 + $0xa0] sm:$0xff]  ;;  %v3078_v3 = vpack.c.bf16 %v172_v58, %v168_v57  ;;  %v169_v4 = vld [vmem:[#allocation3 + $0x90] sm:$0xff]  ;;  %v3081_v6 = vpack.c.bf16 %v174_v62, %v170_v61 }
  0x68   :  { %2062 = vmatpush1.bf16.msra.mxu1 %v2061_v25  ;;  %2032 = vmatprep.subr.bf16.mxu0 %v2031_v26  ;;  %v173_v5 = vld [vmem:[#allocation3 + $0xb0] sm:$0xff]  ;;  %v176_v7 = vld [vmem:[#allocation3 + $0xc8] sm:$0xff]  ;;  %v3084_v10 = vpack.c.bf16 %v171_v2, %v167_v1  ;;  %v178_v11 = vld [vmem:[#allocation3 + $0xd8] sm:$0xff] }
  0x69   :  { %2064 = vmatprep.subr.bf16.mxu1 %v2063_v30  ;;  %v180_v8 = vld [vmem:[#allocation3 + $0xe8] sm:$0xff]  ;;  %v217_v9 = vld [vmem:[#allocation8 + $0x10] sm:$0xff]  ;;  %v182_v12 = vld [vmem:[#allocation3 + $0xf8] sm:$0xff]  ;;  %v3088_v13 = vpack.c.bf16 %v173_v5, %v169_v4 }
  0x6a   :  { %v175_v14 = vld [vmem:[#allocation3 + $0xc0] sm:$0xff]  ;;  %v3092_v16 = vpack.c.bf16 %v180_v8, %v176_v7  ;;  %v177_v17 = vld [vmem:[#allocation3 + $0xd0] sm:$0xff]  ;;  %v3095_v19 = vpack.c.bf16 %v182_v12, %v178_v11  ;;  %v184_v20 = vld [vmem:[#allocation3 + $0x108] sm:$0xff] }
  0x6b   :  { %2034 = vmatpush1.bf16.msra.mxu0 %v2033_v36  ;;  %v179_v15 = vld [vmem:[#allocation3 + $0xe0] sm:$0xff]  ;;  %v181_v18 = vld [vmem:[#allocation3 + $0xf0] sm:$0xff]  ;;  %v188_v21 = vld [vmem:[#allocation3 + $0x128] sm:$0xff] }
  0x6c   :  { %2066 = vmatpush1.bf16.msra.mxu1 %v2065_v37  ;;  %2068 = vmatprep.subr.bf16.mxu0 %v3055_v38  ;;  %v218_v22 = vld [vmem:[#allocation8 + $0x18] sm:$0xff]  ;;  %v3098_v23 = vpack.c.bf16 %v179_v15, %v175_v14  ;;  %v3102_v26 = vpack.c.bf16 %v181_v18, %v177_v17  ;;  %v183_v27 = vld [vmem:[#allocation3 + $0x100] sm:$0xff]  ;;  %v3106_v29 = vpack.c.bf16 %v188_v21, %v184_v20  ;;  %v185_v30 = vld [vmem:[#allocation3 + $0x110] sm:$0xff] }
  0x6d   :  { %2100 = vmatprep.subr.bf16.mxu1 %v3057_v41  ;;  %v186_v24 = vld [vmem:[#allocation3 + $0x118] sm:$0xff]  ;;  %v187_v28 = vld [vmem:[#allocation3 + $0x120] sm:$0xff]  ;;  %v189_v31 = vld [vmem:[#allocation3 + $0x130] sm:$0xff] }
  0x6e   :  { %310 = vmatmul.mubr.f32.vlgmr.msra.gmra.mrb[0].mxu0 %v215_v46  ;;  %v190_v25 = vld [vmem:[#allocation3 + $0x138] sm:$0xff]  ;;  %v192_v33 = vld [vmem:[#allocation3 + $0x148] sm:$0xff]  ;;  %v219_v35 = vld [vmem:[#allocation8 + $0x20] sm:$0xff]  ;;  %v3112_v36 = vpack.c.bf16 %v187_v28, %v183_v27  ;;  %v3116_v40 = vpack.c.bf16 %v189_v31, %v185_v30  ;;  %v225_v30 = vlaneseq }
  0x6f   :  { %423 = vmatmul.mubr.f32.vlgmr.msra.gmra.mrb[0].mxu1 %v215_v46  ;;  %2070 = vmatpush1.bf16.msra.mxu0 %v3059_v47  ;;  %v3109_v32 = vpack.c.bf16 %v190_v25, %v186_v24  ;;  %v196_v34 = vld [vmem:[#allocation3 + $0x168] sm:$0xff]  ;;  %v194_v37 = vld [vmem:[#allocation3 + $0x158] sm:$0xff]  ;;  %v191_v42 = vld [vmem:[#allocation3 + $0x140] sm:$0xff] }
  0x70   :  { %2102 = vmatpush1.bf16.msra.mxu1 %v3062_v50  ;;  %315 = vmatprep.mubr.f32.mxu0 %v2953_v0  ;;  %v198_v39 = vld [vmem:[#allocation3 + $0x178] sm:$0xff]  ;;  %v195_v43 = vld [vmem:[#allocation3 + $0x160] sm:$0xff]  ;;  %v3120_v44 = vpack.c.bf16 %v196_v34, %v192_v33  ;;  %v193_v45 = vld [vmem:[#allocation3 + $0x150] sm:$0xff]  ;;  %v226_v31 = vshrl.u32 %v225_v30, 7 }
  0x71   :  { %428 = vmatprep.mubr.f32.mxu1 %v2953_v0  ;;  %2072 = vmatprep.subr.bf16.mxu0 %v3065_v53  ;;  %v197_v46 = vld [vmem:[#allocation3 + $0x170] sm:$0xff]  ;;  %v3123_v48 = vpack.c.bf16 %v198_v39, %v194_v37  ;;  %v200_v49 = vld [vmem:[#allocation3 + $0x188] sm:$0xff]  ;;  %v3126_v54 = vpack.c.bf16 %v195_v43, %v191_v42  ;;  %v202_v55 = vld [vmem:[#allocation3 + $0x198] sm:$0xff] }
  0x72   :  { %316 = vmatmul.mubr.f32.gmra.mrb[2].mxu0 %v216_v59  ;;  %2104 = vmatprep.subr.bf16.mxu1 %v3067_v56  ;;  %v204_v51 = vld [vmem:[#allocation3 + $0x1a8] sm:$0xff]  ;;  %v206_v57 = vld [vmem:[#allocation3 + $0x1b8] sm:$0xff]  ;;  %v3130_v58 = vpack.c.bf16 %v197_v46, %v193_v45  ;;  %v203_v61 = vld [vmem:[#allocation3 + $0x1a0] sm:$0xff]  ;;  %v227_v33 = vsub.s32 0, %v226_v31  ;;  %v239_v43 = vsub.s32 3, %v226_v31 }
  0x73   :  { %429 = vmatmul.mubr.f32.gmra.mrb[2].mxu1 %v216_v59  ;;  %2074 = vmatpush1.bf16.msra.mxu0 %v3070_v60  ;;  %v220_v52 = vld [vmem:[#allocation8 + $0x28] sm:$0xff]  ;;  %v199_v59 = vld [vmem:[#allocation3 + $0x180] sm:$0xff]  ;;  %v3134_v62 = vpack.c.bf16 %v204_v51, %v200_v49  ;;  %v201_v1 = vld [vmem:[#allocation3 + $0x190] sm:$0xff]  ;;  %v3137_v4 = vpack.c.bf16 %v206_v57, %v202_v55 }
  0x74   :  { %2106 = vmatpush1.bf16.msra.mxu1 %v3074_v63  ;;  %321 = vmatprep.mubr.f32.mxu0 %v2953_v0  ;;  %v205_v2 = vld [vmem:[#allocation3 + $0x1b0] sm:$0xff]  ;;  %v208_v5 = vld [vmem:[#allocation3 + $0x1c8] sm:$0xff]  ;;  %v210_v11 = vld [vmem:[#allocation3 + $0x1d8] sm:$0xff] }
  0x75   :  { %434 = vmatprep.mubr.f32.mxu1 %v2953_v0  ;;  %2076 = vmatprep.subr.bf16.mxu0 %v3078_v3  ;;  %v212_v7 = vld [vmem:[#allocation3 + $0x1e8] sm:$0xff]  ;;  %v221_v8 = vld [vmem:[#allocation8 + $0x30] sm:$0xff]  ;;  %v214_v12 = vld [vmem:[#allocation3 + $0x1f8] sm:$0xff]  ;;  %v3144_v14 = vpack.c.bf16 %v205_v2, %v201_v1 }
  0x76   :  { %322 = vmatmul.mubr.f32.gmra.mrb[4].mxu0 %v217_v9  ;;  %2108 = vmatprep.subr.bf16.mxu1 %v3081_v6  ;;  %v207_v15 = vld [vmem:[#allocation3 + $0x1c0] sm:$0xff]  ;;  %v3148_v18 = vpack.c.bf16 %v212_v7, %v208_v5  ;;  %v209_v20 = vld [vmem:[#allocation3 + $0x1d0] sm:$0xff]  ;;  %v222_v24 = vld [vmem:[#allocation8 + $0x38] sm:$0xff] }
  0x77   :  { %435 = vmatmul.mubr.f32.gmra.mrb[4].mxu1 %v217_v9  ;;  %2078 = vmatpush1.bf16.msra.mxu0 %v3084_v10  ;;  %v3140_v9 = vpack.c.bf16 %v203_v61, %v199_v59  ;;  %v211_v17 = vld [vmem:[#allocation3 + $0x1e0] sm:$0xff]  ;;  %v213_v21 = vld [vmem:[#allocation3 + $0x1f0] sm:$0xff]  ;;  %v235_v61 = vsub.s32 2, %v226_v31 }
  0x78   :  { %2110 = vmatpush1.bf16.msra.mxu1 %v3088_v13  ;;  %327 = vmatprep.mubr.f32.mxu0 %v2953_v0  ;;  %v3154_v25 = vpack.c.bf16 %v211_v17, %v207_v15  ;;  %v3158_v27 = vpack.c.bf16 %v213_v21, %v209_v20  ;;  %v83_v28 = vld [vmem:[%s3532_s4] sm:$0xff] }
  0x79   :  { %440 = vmatprep.mubr.f32.mxu1 %v2953_v0  ;;  %2080 = vmatprep.subr.bf16.mxu0 %v3092_v16  ;;  %v223_v34 = vld [vmem:[#allocation11] sm:$0xf] }
  0x7a   :  { %328 = vmatmul.mubr.f32.gmra.mrb[6].mxu0 %v218_v22  ;;  %2112 = vmatprep.subr.bf16.mxu1 %v3095_v19  ;;  %v3206_v37 = vrot.slane %v223_v34, %v227_v33  ;;  %v3212_v59 = vrot.slane %v223_v34, %v239_v43  ;;  %v3215_v2 = vrot.slane %v223_v34, %v235_v61  ;;  %v85_v21 = vld [vmem:[%s3533_s5] sm:$0xff]  ;;  %s2954_s5 = smov [#allocation14]  }
  0x7b   :  { %441 = vmatmul.mubr.f32.gmra.mrb[6].mxu1 %v218_v22  ;;  %2082 = vmatpush1.bf16.msra.mxu0 %v3098_v23  ;;  %v3151_v22 = vpack.c.bf16 %v214_v12, %v210_v11  ;;  %s1937_s11 = sshll.u32 %s2954_s5, 4  ;;  %s1938_s11 = int_to_ptr.vmem [resolvable:$true] %s1937_s11 }
  0x7c   :  { %2114 = vmatpush1.bf16.msra.mxu1 %v3102_v26  ;;  %333 = vmatprep.mubr.f32.mxu0 %v2953_v0  ;;  %s2869_s18 = scalar_lea.vmem %s1938_s11, 128  ;;  %p2874_p5 = scmp.lt.s32.totalorder %s1938_s11, %s1938_s11 }
  0x7d   :  { %446 = vmatprep.mubr.f32.mxu1 %v2953_v0  ;;  %2084 = vmatprep.subr.bf16.mxu0 %v3106_v29  ;;  %p2870_p4 = scmp.ne.s32.totalorder %s1938_s11, %s2869_s18  ;;  %p2875_p6 = scmp.lt.s32.totalorder %s2869_s18, %s2869_s18 }
  0x7e   :  { %334 = vmatmul.mubr.f32.gmra.mrb[8].mxu0 %v219_v35  ;;  %2116 = vmatprep.subr.bf16.mxu1 %v3109_v32 }
  0x7f   :  { %447 = vmatmul.mubr.f32.gmra.mrb[8].mxu1 %v219_v35  ;;  %2086 = vmatpush1.bf16.msra.mxu0 %v3112_v36  ;;  %v231_v35 = vsub.s32 1, %v226_v31  ;;  %p2876_p7 = por %p2875_p6, %p2874_p5 }
  0x80   :  { %2118 = vmatpush1.bf16.msra.mxu1 %v3116_v40  ;;  %339 = vmatprep.mubr.f32.mxu0 %v2953_v0 }
  0x81   :  { %452 = vmatprep.mubr.f32.mxu1 %v2953_v0  ;;  %2088 = vmatprep.subr.bf16.mxu0 %v3120_v44  ;;  %v3208_v39 = vrot.slane %v223_v34, %v231_v35  ;;  %p2877_p8 = pnand %p2876_p7, %p2870_p4 }
  0x82   :  { %340 = vmatmul.mubr.f32.gmra.mrb[10].mxu0 %v220_v52  ;;  %2120 = vmatprep.subr.bf16.mxu1 %v3123_v48 }
  0x83   :  { %453 = vmatmul.mubr.f32.gmra.mrb[10].mxu1 %v220_v52  ;;  %2090 = vmatpush1.bf16.msra.mxu0 %v3126_v54 }
  0x84   :  { %2122 = vmatpush1.bf16.msra.mxu1 %v3130_v58  ;;  %345 = vmatprep.mubr.f32.mxu0 %v2953_v0 }
  0x85   :  { %458 = vmatprep.mubr.f32.mxu1 %v2953_v0  ;;  %2092 = vmatprep.subr.bf16.mxu0 %v3134_v62 }
  0x86   :  { %346 = vmatmul.mubr.f32.gmra.mrb[12].mxu0 %v221_v8  ;;  %2124 = vmatprep.subr.bf16.mxu1 %v3137_v4 }
  0x87   :  { %459 = vmatmul.mubr.f32.gmra.mrb[12].mxu1 %v221_v8  ;;  %2094 = vmatpush1.bf16.msra.mxu0 %v3140_v9 }
  0x88   :  { %2126 = vmatpush1.bf16.msra.mxu1 %v3144_v14  ;;  %351 = vmatprep.mubr.f32.mxu0 %v2953_v0 }
  0x89   :  { %464 = vmatprep.mubr.f32.mxu1 %v2953_v0  ;;  %2096 = vmatprep.subr.bf16.mxu0 %v3148_v18 }
  0x8a   :  { %352 = vmatmul.mubr.f32.gmra.mrb[14].mxu0 %v222_v24  ;;  %2128 = vmatprep.subr.bf16.mxu1 %v3151_v22 }
  0x8b   :  { %465 = vmatmul.mubr.f32.gmra.mrb[14].mxu1 %v222_v24  ;;  %2098 = vmatpush1.bf16.msra.mxu0 %v3154_v25 }
  0x8c   :  { %2130 = vmatpush1.bf16.msra.mxu1 %v3158_v27  ;;  %573 = vmatprep.mubr.f32.mxu0 %v2953_v0 }
  0x8d   :  { %644 = vmatprep.mubr.f32.mxu1 %v2953_v0  ;;  %2132 = vmatprep.subr.bf16.mxu0 %v3055_v38 }
  0x8e   :  { %574 = vmatmul.mubr.f32.vlgmr.msra.gmra.mrb[0].mxu0 %v83_v28  ;;  %2164 = vmatprep.subr.bf16.mxu1 %v3057_v41 }
  0x8f   :  { %645 = vmatmul.mubr.f32.vlgmr.msra.gmra.mrb[0].mxu1 %v83_v28  ;;  %2134 = vmatpush1.bf16.msra.mxu0 %v3059_v47 }
  0x90   :  { %2166 = vmatpush1.bf16.msra.mxu1 %v3062_v50  ;;  %2136 = vmatprep.subr.bf16.mxu0 %v3065_v53 }
  0x91   :  { %2168 = vmatprep.subr.bf16.mxu1 %v3067_v56  ;;  %748 = vmatprep.mubr.f32.mxu0 %v2953_v0 }
  0x92   :  { %819 = vmatprep.mubr.f32.mxu1 %v2953_v0 }
  0x93   :  { %2138 = vmatpush1.bf16.msra.mxu0 %v3070_v60 }
  0x94   :  { %2170 = vmatpush1.bf16.msra.mxu1 %v3074_v63  ;;  %2140 = vmatprep.subr.bf16.mxu0 %v3078_v3 }
  0x95   :  { %2172 = vmatprep.subr.bf16.mxu1 %v3081_v6 }
  0x97   :  { %2142 = vmatpush1.bf16.msra.mxu0 %v3084_v10 }
  0x98   :  { %2174 = vmatpush1.bf16.msra.mxu1 %v3088_v13  ;;  %2144 = vmatprep.subr.bf16.mxu0 %v3092_v16 }
  0x99   :  { %2176 = vmatprep.subr.bf16.mxu1 %v3095_v19 }
  0x9b   :  { %2146 = vmatpush1.bf16.msra.mxu0 %v3098_v23 }
  0x9c   :  { %2178 = vmatpush1.bf16.msra.mxu1 %v3102_v26  ;;  %2148 = vmatprep.subr.bf16.mxu0 %v3106_v29 }
  0x9d   :  { %2180 = vmatprep.subr.bf16.mxu1 %v3109_v32 }
  0x9f   :  { %2150 = vmatpush1.bf16.msra.mxu0 %v3112_v36 }
  0xa0   :  { %2182 = vmatpush1.bf16.msra.mxu1 %v3116_v40  ;;  %2152 = vmatprep.subr.bf16.mxu0 %v3120_v44 }
  0xa1   :  { %2184 = vmatprep.subr.bf16.mxu1 %v3123_v48 }
  0xa3   :  { %2154 = vmatpush1.bf16.msra.mxu0 %v3126_v54 }
  0xa4   :  { %2186 = vmatpush1.bf16.msra.mxu1 %v3130_v58  ;;  %2156 = vmatprep.subr.bf16.mxu0 %v3134_v62 }
  0xa5   :  { %2188 = vmatprep.subr.bf16.mxu1 %v3137_v4 }
  0xa7   :  { %2158 = vmatpush1.bf16.msra.mxu0 %v3140_v9 }
  0xa8   :  { %2190 = vmatpush1.bf16.msra.mxu1 %v3144_v14  ;;  %2160 = vmatprep.subr.bf16.mxu0 %v3148_v18 }
  0xa9   :  { %2192 = vmatprep.subr.bf16.mxu1 %v3151_v22 }
  0xab   :  { %2162 = vmatpush1.bf16.msra.mxu0 %v3154_v25 }
  0xac   :  { %2194 = vmatpush1.bf16.msra.mxu1 %v3158_v27  ;;  %2196 = vmatprep.subr.bf16.mxu0 %v3055_v38 }
  0xad   :  { %2228 = vmatprep.subr.bf16.mxu1 %v3057_v41 }
 0x161   :  { %v575_v42 = vpop.f32.mrb[0].mxu0 }
 0x162   :  { %v2579_v45 = vadd.f32 %v575_v42, %v3206_v37  ;;  %v646_v46 = vpop.f32.mrb[0].mxu1  ;;  %v577_v49 = vpop.f32.mrb[1].mxu0 }
 0x163   :  { %v2580_v51 = vadd.f32 %v577_v49, %v3208_v39  ;;  %v648_v52 = vpop.f32.mrb[1].mxu1  ;;  %v2595_v7 = vadd.f32 %v646_v46, %v3215_v2 }
 0x164   :  { %v1977_v55 = vmul.f32 -1.442695, %v2579_v45  ;;  %v2596_v1 = vadd.f32 %v648_v52, %v3212_v59 }
 0x165   :  { %v1978_v57 = vmul.f32 -1.442695, %v2580_v51 }
 0x166   :  { %2653 = vpow2.f32 %v1977_v55  ;;  %v1979_v5 = vmul.f32 -1.442695, %v2596_v1 }
 0x167   :  { %2655 = vpow2.f32 %v1978_v57 }
 0x168   :  { %2657 = vpow2.f32 %v1979_v5 }
 0x169   :  { %2659 = vtanh.f32 %v2595_v7 }
 0x170   :  { %v2654_v8 = vpop.eup %2653 }
 0x171   :  { %v2656_v11 = vpop.eup %2655  ;;  %v658_v12 = vadd.f32 1.0, %v2654_v8 }
 0x172   :  { %v664_v15 = vadd.f32 1.0, %v2656_v11  ;;  %v2658_v17 = vpop.eup %2657 }
 0x173   :  { %2661 = vrcp.f32 %v658_v12  ;;  %v2660_v20 = vpop.eup %2659  ;;  %v671_v31 = vadd.f32 1.0, %v2658_v17 }
 0x174   :  { %2663 = vrcp.f32 %v664_v15 }
 0x175   :  { %2665 = vrcp.f32 %v671_v31 }
 0x17d   :  { %v2662_v24 = vpop.eup %2661 }
 0x17e   :  { %v2664_v28 = vpop.eup %2663  ;;  %v675_v30 = vmul.f32 %v2662_v24, %v2660_v20 }
 0x17f   :  { %v674_v33 = vmul.f32 %v2664_v28, %v85_v21  ;;  %v2666_v35 = vpop.eup %2665 }
 0x181   :  { %v3221_v34 = vadd.f32 %v675_v30, %v674_v33 }
 0x183   :  { %2667 = vtanh.f32 %v3221_v34 }
 0x18d   :  { %v2668_v42 = vpop.eup %2667 }
 0x18e   :  { %v678_v43 = vmul.f32 %v2668_v42, %v2666_v35 }
 0x190   :  { %679 = vst [vmem:[#allocation13] sm:$0xff] %v678_v43  ;;  %749 = vmatmul.mubr.f32.vlgmr.msra.gmra.mrb[2].mxu0 %v678_v43  ;;  %820 = vmatmul.mubr.f32.vlgmr.msra.gmra.mrb[2].mxu1 %v678_v43 }
 0x191   :  { %2198 = vmatpush1.bf16.msra.mxu0 %v3059_v47  ;;  %2230 = vmatpush1.bf16.msra.mxu1 %v3062_v50 }
 0x192   :  { %2200 = vmatprep.subr.bf16.mxu0 %v3065_v53  ;;  %2232 = vmatprep.subr.bf16.mxu1 %v3067_v56 }
 0x193   :  { %924 = vmatprep.mubr.f32.mxu0 %v2953_v0  ;;  %995 = vmatprep.mubr.f32.mxu1 %v2953_v0 }
 0x195   :  { %2202 = vmatpush1.bf16.msra.mxu0 %v3070_v60  ;;  %2234 = vmatpush1.bf16.msra.mxu1 %v3074_v63 }
 0x196   :  { %2204 = vmatprep.subr.bf16.mxu0 %v3078_v3  ;;  %2236 = vmatprep.subr.bf16.mxu1 %v3081_v6 }
 0x199   :  { %2206 = vmatpush1.bf16.msra.mxu0 %v3084_v10  ;;  %2238 = vmatpush1.bf16.msra.mxu1 %v3088_v13 }
 0x19a   :  { %2208 = vmatprep.subr.bf16.mxu0 %v3092_v16  ;;  %2240 = vmatprep.subr.bf16.mxu1 %v3095_v19 }
 0x19d   :  { %2210 = vmatpush1.bf16.msra.mxu0 %v3098_v23  ;;  %2242 = vmatpush1.bf16.msra.mxu1 %v3102_v26 }
 0x19e   :  { %2212 = vmatprep.subr.bf16.mxu0 %v3106_v29  ;;  %2244 = vmatprep.subr.bf16.mxu1 %v3109_v32 }
 0x1a1   :  { %2214 = vmatpush1.bf16.msra.mxu0 %v3112_v36  ;;  %2246 = vmatpush1.bf16.msra.mxu1 %v3116_v40 }
 0x1a2   :  { %2216 = vmatprep.subr.bf16.mxu0 %v3120_v44  ;;  %2248 = vmatprep.subr.bf16.mxu1 %v3123_v48 }
 0x1a5   :  { %2218 = vmatpush1.bf16.msra.mxu0 %v3126_v54  ;;  %2250 = vmatpush1.bf16.msra.mxu1 %v3130_v58 }
 0x1a6   :  { %2220 = vmatprep.subr.bf16.mxu0 %v3134_v62  ;;  %2252 = vmatprep.subr.bf16.mxu1 %v3137_v4 }
 0x1a9   :  { %2222 = vmatpush1.bf16.msra.mxu0 %v3140_v9  ;;  %2254 = vmatpush1.bf16.msra.mxu1 %v3144_v14 }
 0x1aa   :  { %2224 = vmatprep.subr.bf16.mxu0 %v3148_v18  ;;  %2256 = vmatprep.subr.bf16.mxu1 %v3151_v22 }
 0x1ad   :  { %2226 = vmatpush1.bf16.msra.mxu0 %v3154_v25  ;;  %2258 = vmatpush1.bf16.msra.mxu1 %v3158_v27 }
 0x1ae   :  { %2260 = vmatprep.subr.bf16.mxu0 %v3055_v38  ;;  %2292 = vmatprep.subr.bf16.mxu1 %v3057_v41 }
 0x263   :  { %v750_v45 = vpop.f32.mrb[2].mxu0  ;;  %v821_v46 = vpop.f32.mrb[2].mxu1 }
 0x264   :  { %v2581_v49 = vadd.f32 %v750_v45, %v3206_v37  ;;  %v752_v51 = vpop.f32.mrb[3].mxu0  ;;  %v823_v52 = vpop.f32.mrb[3].mxu1  ;;  %v2597_v7 = vadd.f32 %v821_v46, %v3215_v2 }
 0x265   :  { %v2582_v55 = vadd.f32 %v752_v51, %v3208_v39  ;;  %v2598_v1 = vadd.f32 %v823_v52, %v3212_v59 }
 0x266   :  { %v1980_v57 = vmul.f32 -1.442695, %v2581_v49 }
 0x267   :  { %v1981_v61 = vmul.f32 -1.442695, %v2582_v55  ;;  %v1982_v5 = vmul.f32 -1.442695, %v2598_v1 }
 0x268   :  { %2669 = vpow2.f32 %v1980_v57 }
 0x269   :  { %2671 = vpow2.f32 %v1981_v61 }
 0x26a   :  { %2673 = vpow2.f32 %v1982_v5 }
 0x26b   :  { %2675 = vtanh.f32 %v2597_v7 }
 0x272   :  { %v2670_v8 = vpop.eup %2669 }
 0x273   :  { %v2672_v11 = vpop.eup %2671  ;;  %v833_v12 = vadd.f32 1.0, %v2670_v8 }
 0x274   :  { %v839_v15 = vadd.f32 1.0, %v2672_v11  ;;  %v2674_v17 = vpop.eup %2673 }
 0x275   :  { %2677 = vrcp.f32 %v833_v12  ;;  %v2676_v20 = vpop.eup %2675  ;;  %v846_v30 = vadd.f32 1.0, %v2674_v17 }
 0x276   :  { %2679 = vrcp.f32 %v839_v15 }
 0x277   :  { %2681 = vrcp.f32 %v846_v30 }
 0x27f   :  { %v2678_v21 = vpop.eup %2677 }
 0x280   :  { %v2680_v24 = vpop.eup %2679  ;;  %v850_v28 = vmul.f32 %v2678_v21, %v2676_v20 }
 0x281   :  { %v849_v31 = vmul.f32 %v2680_v24, %v3221_v34  ;;  %v2682_v35 = vpop.eup %2681 }
 0x283   :  { %v3263_v33 = vadd.f32 %v850_v28, %v849_v31 }
 0x285   :  { %2683 = vtanh.f32 %v3263_v33 }
 0x28f   :  { %v2684_v42 = vpop.eup %2683 }
 0x290   :  { %v853_v43 = vmul.f32 %v2684_v42, %v2682_v35 }
 0x292   :  { %855 = vst [vmem:[#allocation13 + $0x8] sm:$0xff] %v853_v43  ;;  %925 = vmatmul.mubr.f32.vlgmr.msra.gmra.mrb[4].mxu0 %v853_v43  ;;  %996 = vmatmul.mubr.f32.vlgmr.msra.gmra.mrb[4].mxu1 %v853_v43 }
 0x293   :  { %2262 = vmatpush1.bf16.msra.mxu0 %v3059_v47  ;;  %2294 = vmatpush1.bf16.msra.mxu1 %v3062_v50 }
 0x294   :  { %2264 = vmatprep.subr.bf16.mxu0 %v3065_v53  ;;  %2296 = vmatprep.subr.bf16.mxu1 %v3067_v56 }
 0x295   :  { %1100 = vmatprep.mubr.f32.mxu0 %v2953_v0  ;;  %1171 = vmatprep.mubr.f32.mxu1 %v2953_v0 }
 0x297   :  { %2266 = vmatpush1.bf16.msra.mxu0 %v3070_v60  ;;  %2298 = vmatpush1.bf16.msra.mxu1 %v3074_v63 }
 0x298   :  { %2268 = vmatprep.subr.bf16.mxu0 %v3078_v3  ;;  %2300 = vmatprep.subr.bf16.mxu1 %v3081_v6 }
 0x29b   :  { %2270 = vmatpush1.bf16.msra.mxu0 %v3084_v10  ;;  %2302 = vmatpush1.bf16.msra.mxu1 %v3088_v13 }
 0x29c   :  { %2272 = vmatprep.subr.bf16.mxu0 %v3092_v16  ;;  %2304 = vmatprep.subr.bf16.mxu1 %v3095_v19 }
 0x29f   :  { %2274 = vmatpush1.bf16.msra.mxu0 %v3098_v23  ;;  %2306 = vmatpush1.bf16.msra.mxu1 %v3102_v26 }
 0x2a0   :  { %2276 = vmatprep.subr.bf16.mxu0 %v3106_v29  ;;  %2308 = vmatprep.subr.bf16.mxu1 %v3109_v32 }
 0x2a3   :  { %2278 = vmatpush1.bf16.msra.mxu0 %v3112_v36  ;;  %2310 = vmatpush1.bf16.msra.mxu1 %v3116_v40 }
 0x2a4   :  { %2280 = vmatprep.subr.bf16.mxu0 %v3120_v44  ;;  %2312 = vmatprep.subr.bf16.mxu1 %v3123_v48 }
 0x2a7   :  { %2282 = vmatpush1.bf16.msra.mxu0 %v3126_v54  ;;  %2314 = vmatpush1.bf16.msra.mxu1 %v3130_v58 }
 0x2a8   :  { %2284 = vmatprep.subr.bf16.mxu0 %v3134_v62  ;;  %2316 = vmatprep.subr.bf16.mxu1 %v3137_v4 }
 0x2ab   :  { %2286 = vmatpush1.bf16.msra.mxu0 %v3140_v9  ;;  %2318 = vmatpush1.bf16.msra.mxu1 %v3144_v14 }
 0x2ac   :  { %2288 = vmatprep.subr.bf16.mxu0 %v3148_v18  ;;  %2320 = vmatprep.subr.bf16.mxu1 %v3151_v22 }
 0x2af   :  { %2290 = vmatpush1.bf16.msra.mxu0 %v3154_v25  ;;  %2322 = vmatpush1.bf16.msra.mxu1 %v3158_v27 }
 0x2b0   :  { %2324 = vmatprep.subr.bf16.mxu0 %v3055_v38  ;;  %2356 = vmatprep.subr.bf16.mxu1 %v3057_v41 }
 0x365   :  { %v926_v34 = vpop.f32.mrb[4].mxu0  ;;  %v997_v45 = vpop.f32.mrb[4].mxu1 }
 0x366   :  { %v2583_v46 = vadd.f32 %v926_v34, %v3206_v37  ;;  %v928_v49 = vpop.f32.mrb[5].mxu0  ;;  %v999_v51 = vpop.f32.mrb[5].mxu1  ;;  %v2599_v5 = vadd.f32 %v997_v45, %v3215_v2 }
 0x367   :  { %v2584_v52 = vadd.f32 %v928_v49, %v3208_v39  ;;  %v2600_v61 = vadd.f32 %v999_v51, %v3212_v59 }
 0x368   :  { %v1983_v55 = vmul.f32 -1.442695, %v2583_v46 }
 0x369   :  { %v1984_v57 = vmul.f32 -1.442695, %v2584_v52  ;;  %v1985_v1 = vmul.f32 -1.442695, %v2600_v61 }
 0x36a   :  { %2685 = vpow2.f32 %v1983_v55 }
 0x36b   :  { %2687 = vpow2.f32 %v1984_v57 }
 0x36c   :  { %2689 = vpow2.f32 %v1985_v1 }
 0x36d   :  { %2691 = vtanh.f32 %v2599_v5 }
 0x374   :  { %v2686_v7 = vpop.eup %2685 }
 0x375   :  { %v2688_v8 = vpop.eup %2687  ;;  %v1009_v11 = vadd.f32 1.0, %v2686_v7 }
 0x376   :  { %v1015_v12 = vadd.f32 1.0, %v2688_v8  ;;  %v2690_v15 = vpop.eup %2689 }
 0x377   :  { %2693 = vrcp.f32 %v1009_v11  ;;  %v2692_v17 = vpop.eup %2691  ;;  %v1022_v28 = vadd.f32 1.0, %v2690_v15 }
 0x378   :  { %2695 = vrcp.f32 %v1015_v12 }
 0x379   :  { %2697 = vrcp.f32 %v1022_v28 }
 0x381   :  { %v2694_v20 = vpop.eup %2693 }
 0x382   :  { %v2696_v21 = vpop.eup %2695  ;;  %v1026_v24 = vmul.f32 %v2694_v20, %v2692_v17 }
 0x383   :  { %v1025_v30 = vmul.f32 %v2696_v21, %v3263_v33  ;;  %v2698_v35 = vpop.eup %2697 }
 0x385   :  { %v3305_v31 = vadd.f32 %v1026_v24, %v1025_v30 }
 0x387   :  { %2699 = vtanh.f32 %v3305_v31 }
 0x391   :  { %v2700_v42 = vpop.eup %2699 }
 0x392   :  { %v1029_v43 = vmul.f32 %v2700_v42, %v2698_v35 }
 0x394   :  { %1031 = vst [vmem:[#allocation13 + $0x10] sm:$0xff] %v1029_v43  ;;  %1101 = vmatmul.mubr.f32.vlgmr.msra.gmra.mrb[6].mxu0 %v1029_v43  ;;  %1172 = vmatmul.mubr.f32.vlgmr.msra.gmra.mrb[6].mxu1 %v1029_v43 }
 0x395   :  { %2326 = vmatpush1.bf16.msra.mxu0 %v3059_v47  ;;  %2358 = vmatpush1.bf16.msra.mxu1 %v3062_v50 }
 0x396   :  { %2328 = vmatprep.subr.bf16.mxu0 %v3065_v53  ;;  %2360 = vmatprep.subr.bf16.mxu1 %v3067_v56 }
 0x397   :  { %1276 = vmatprep.mubr.f32.mxu0 %v2953_v0  ;;  %1347 = vmatprep.mubr.f32.mxu1 %v2953_v0 }
 0x399   :  { %2330 = vmatpush1.bf16.msra.mxu0 %v3070_v60  ;;  %2362 = vmatpush1.bf16.msra.mxu1 %v3074_v63 }
 0x39a   :  { %2332 = vmatprep.subr.bf16.mxu0 %v3078_v3  ;;  %2364 = vmatprep.subr.bf16.mxu1 %v3081_v6 }
 0x39d   :  { %2334 = vmatpush1.bf16.msra.mxu0 %v3084_v10  ;;  %2366 = vmatpush1.bf16.msra.mxu1 %v3088_v13 }
 0x39e   :  { %2336 = vmatprep.subr.bf16.mxu0 %v3092_v16  ;;  %2368 = vmatprep.subr.bf16.mxu1 %v3095_v19 }
 0x3a1   :  { %2338 = vmatpush1.bf16.msra.mxu0 %v3098_v23  ;;  %2370 = vmatpush1.bf16.msra.mxu1 %v3102_v26 }
 0x3a2   :  { %2340 = vmatprep.subr.bf16.mxu0 %v3106_v29  ;;  %2372 = vmatprep.subr.bf16.mxu1 %v3109_v32 }
 0x3a5   :  { %2342 = vmatpush1.bf16.msra.mxu0 %v3112_v36  ;;  %2374 = vmatpush1.bf16.msra.mxu1 %v3116_v40 }
 0x3a6   :  { %2344 = vmatprep.subr.bf16.mxu0 %v3120_v44  ;;  %2376 = vmatprep.subr.bf16.mxu1 %v3123_v48 }
 0x3a9   :  { %2346 = vmatpush1.bf16.msra.mxu0 %v3126_v54  ;;  %2378 = vmatpush1.bf16.msra.mxu1 %v3130_v58 }
 0x3aa   :  { %2348 = vmatprep.subr.bf16.mxu0 %v3134_v62  ;;  %2380 = vmatprep.subr.bf16.mxu1 %v3137_v4 }
 0x3ad   :  { %2350 = vmatpush1.bf16.msra.mxu0 %v3140_v9  ;;  %2382 = vmatpush1.bf16.msra.mxu1 %v3144_v14 }
 0x3ae   :  { %2352 = vmatprep.subr.bf16.mxu0 %v3148_v18  ;;  %2384 = vmatprep.subr.bf16.mxu1 %v3151_v22 }
 0x3b1   :  { %2354 = vmatpush1.bf16.msra.mxu0 %v3154_v25  ;;  %2386 = vmatpush1.bf16.msra.mxu1 %v3158_v27 }
 0x3b2   :  { %2388 = vmatprep.subr.bf16.mxu0 %v3055_v38  ;;  %2420 = vmatprep.subr.bf16.mxu1 %v3057_v41 }
 0x467   :  { %v1102_v33 = vpop.f32.mrb[6].mxu0  ;;  %v1173_v34 = vpop.f32.mrb[6].mxu1 }
 0x468   :  { %v2585_v45 = vadd.f32 %v1102_v33, %v3206_v37  ;;  %v1104_v46 = vpop.f32.mrb[7].mxu0  ;;  %v1175_v49 = vpop.f32.mrb[7].mxu1  ;;  %v2601_v1 = vadd.f32 %v1173_v34, %v3215_v2 }
 0x469   :  { %v2586_v51 = vadd.f32 %v1104_v46, %v3208_v39  ;;  %v2602_v57 = vadd.f32 %v1175_v49, %v3212_v59 }
 0x46a   :  { %v1986_v52 = vmul.f32 -1.442695, %v2585_v45 }
 0x46b   :  { %v1987_v55 = vmul.f32 -1.442695, %v2586_v51  ;;  %v1988_v61 = vmul.f32 -1.442695, %v2602_v57 }
 0x46c   :  { %2701 = vpow2.f32 %v1986_v52 }
 0x46d   :  { %2703 = vpow2.f32 %v1987_v55 }
 0x46e   :  { %2705 = vpow2.f32 %v1988_v61 }
 0x46f   :  { %2707 = vtanh.f32 %v2601_v1 }
 0x476   :  { %v2702_v5 = vpop.eup %2701 }
 0x477   :  { %v2704_v7 = vpop.eup %2703  ;;  %v1185_v8 = vadd.f32 1.0, %v2702_v5 }
 0x478   :  { %v1191_v11 = vadd.f32 1.0, %v2704_v7  ;;  %v2706_v12 = vpop.eup %2705 }
 0x479   :  { %2709 = vrcp.f32 %v1185_v8  ;;  %v2708_v15 = vpop.eup %2707  ;;  %v1198_v24 = vadd.f32 1.0, %v2706_v12 }
 0x47a   :  { %2711 = vrcp.f32 %v1191_v11 }
 0x47b   :  { %2713 = vrcp.f32 %v1198_v24 }
 0x483   :  { %v2710_v17 = vpop.eup %2709 }
 0x484   :  { %v2712_v20 = vpop.eup %2711  ;;  %v1202_v21 = vmul.f32 %v2710_v17, %v2708_v15 }
 0x485   :  { %v1201_v28 = vmul.f32 %v2712_v20, %v3305_v31  ;;  %v2714_v35 = vpop.eup %2713 }
 0x487   :  { %v3347_v30 = vadd.f32 %v1202_v21, %v1201_v28 }
 0x489   :  { %2715 = vtanh.f32 %v3347_v30 }
 0x493   :  { %v2716_v42 = vpop.eup %2715 }
 0x494   :  { %v1205_v43 = vmul.f32 %v2716_v42, %v2714_v35 }
 0x496   :  { %1207 = vst [vmem:[#allocation13 + $0x18] sm:$0xff] %v1205_v43  ;;  %1277 = vmatmul.mubr.f32.vlgmr.msra.gmra.mrb[8].mxu0 %v1205_v43  ;;  %1348 = vmatmul.mubr.f32.vlgmr.msra.gmra.mrb[8].mxu1 %v1205_v43 }
 0x497   :  { %2390 = vmatpush1.bf16.msra.mxu0 %v3059_v47  ;;  %2422 = vmatpush1.bf16.msra.mxu1 %v3062_v50 }
 0x498   :  { %2392 = vmatprep.subr.bf16.mxu0 %v3065_v53  ;;  %2424 = vmatprep.subr.bf16.mxu1 %v3067_v56 }
 0x499   :  { %1452 = vmatprep.mubr.f32.mxu0 %v2953_v0  ;;  %1523 = vmatprep.mubr.f32.mxu1 %v2953_v0 }
 0x49b   :  { %2394 = vmatpush1.bf16.msra.mxu0 %v3070_v60  ;;  %2426 = vmatpush1.bf16.msra.mxu1 %v3074_v63 }
 0x49c   :  { %2396 = vmatprep.subr.bf16.mxu0 %v3078_v3  ;;  %2428 = vmatprep.subr.bf16.mxu1 %v3081_v6 }
 0x49f   :  { %2398 = vmatpush1.bf16.msra.mxu0 %v3084_v10  ;;  %2430 = vmatpush1.bf16.msra.mxu1 %v3088_v13 }
 0x4a0   :  { %2400 = vmatprep.subr.bf16.mxu0 %v3092_v16  ;;  %2432 = vmatprep.subr.bf16.mxu1 %v3095_v19 }
 0x4a3   :  { %2402 = vmatpush1.bf16.msra.mxu0 %v3098_v23  ;;  %2434 = vmatpush1.bf16.msra.mxu1 %v3102_v26 }
 0x4a4   :  { %2404 = vmatprep.subr.bf16.mxu0 %v3106_v29  ;;  %2436 = vmatprep.subr.bf16.mxu1 %v3109_v32 }
 0x4a7   :  { %2406 = vmatpush1.bf16.msra.mxu0 %v3112_v36  ;;  %2438 = vmatpush1.bf16.msra.mxu1 %v3116_v40 }
 0x4a8   :  { %2408 = vmatprep.subr.bf16.mxu0 %v3120_v44  ;;  %2440 = vmatprep.subr.bf16.mxu1 %v3123_v48 }
 0x4ab   :  { %2410 = vmatpush1.bf16.msra.mxu0 %v3126_v54  ;;  %2442 = vmatpush1.bf16.msra.mxu1 %v3130_v58 }
 0x4ac   :  { %2412 = vmatprep.subr.bf16.mxu0 %v3134_v62  ;;  %2444 = vmatprep.subr.bf16.mxu1 %v3137_v4 }
 0x4af   :  { %2414 = vmatpush1.bf16.msra.mxu0 %v3140_v9  ;;  %2446 = vmatpush1.bf16.msra.mxu1 %v3144_v14 }
 0x4b0   :  { %2416 = vmatprep.subr.bf16.mxu0 %v3148_v18  ;;  %2448 = vmatprep.subr.bf16.mxu1 %v3151_v22 }
 0x4b3   :  { %2418 = vmatpush1.bf16.msra.mxu0 %v3154_v25  ;;  %2450 = vmatpush1.bf16.msra.mxu1 %v3158_v27 }
 0x4b4   :  { %2452 = vmatprep.subr.bf16.mxu0 %v3055_v38  ;;  %2484 = vmatprep.subr.bf16.mxu1 %v3057_v41 }
 0x569   :  { %v1278_v31 = vpop.f32.mrb[8].mxu0  ;;  %v1349_v33 = vpop.f32.mrb[8].mxu1 }
 0x56a   :  { %v2587_v34 = vadd.f32 %v1278_v31, %v3206_v37  ;;  %v1280_v45 = vpop.f32.mrb[9].mxu0  ;;  %v1351_v46 = vpop.f32.mrb[9].mxu1  ;;  %v2603_v61 = vadd.f32 %v1349_v33, %v3215_v2 }
 0x56b   :  { %v2588_v49 = vadd.f32 %v1280_v45, %v3208_v39  ;;  %v2604_v55 = vadd.f32 %v1351_v46, %v3212_v59 }
 0x56c   :  { %v1989_v51 = vmul.f32 -1.442695, %v2587_v34 }
 0x56d   :  { %v1990_v52 = vmul.f32 -1.442695, %v2588_v49  ;;  %v1991_v57 = vmul.f32 -1.442695, %v2604_v55 }
 0x56e   :  { %2717 = vpow2.f32 %v1989_v51 }
 0x56f   :  { %2719 = vpow2.f32 %v1990_v52 }
 0x570   :  { %2721 = vpow2.f32 %v1991_v57 }
 0x571   :  { %2723 = vtanh.f32 %v2603_v61 }
 0x578   :  { %v2718_v1 = vpop.eup %2717 }
 0x579   :  { %v2720_v5 = vpop.eup %2719  ;;  %v1361_v7 = vadd.f32 1.0, %v2718_v1 }
 0x57a   :  { %v1367_v8 = vadd.f32 1.0, %v2720_v5  ;;  %v2722_v11 = vpop.eup %2721 }
 0x57b   :  { %2725 = vrcp.f32 %v1361_v7  ;;  %v2724_v12 = vpop.eup %2723  ;;  %v1374_v21 = vadd.f32 1.0, %v2722_v11 }
 0x57c   :  { %2727 = vrcp.f32 %v1367_v8 }
 0x57d   :  { %2729 = vrcp.f32 %v1374_v21 }
 0x585   :  { %v2726_v15 = vpop.eup %2725 }
 0x586   :  { %v2728_v17 = vpop.eup %2727  ;;  %v1378_v20 = vmul.f32 %v2726_v15, %v2724_v12 }
 0x587   :  { %v1377_v24 = vmul.f32 %v2728_v17, %v3347_v30  ;;  %v2730_v35 = vpop.eup %2729 }
 0x589   :  { %v3389_v28 = vadd.f32 %v1378_v20, %v1377_v24 }
 0x58b   :  { %2731 = vtanh.f32 %v3389_v28 }
 0x595   :  { %v2732_v42 = vpop.eup %2731 }
 0x596   :  { %v1381_v43 = vmul.f32 %v2732_v42, %v2730_v35 }
 0x598   :  { %1383 = vst [vmem:[#allocation13 + $0x20] sm:$0xff] %v1381_v43  ;;  %1453 = vmatmul.mubr.f32.vlgmr.msra.gmra.mrb[10].mxu0 %v1381_v43  ;;  %1524 = vmatmul.mubr.f32.vlgmr.msra.gmra.mrb[10].mxu1 %v1381_v43 }
 0x599   :  { %2454 = vmatpush1.bf16.msra.mxu0 %v3059_v47  ;;  %2486 = vmatpush1.bf16.msra.mxu1 %v3062_v50 }
 0x59a   :  { %2456 = vmatprep.subr.bf16.mxu0 %v3065_v53  ;;  %2488 = vmatprep.subr.bf16.mxu1 %v3067_v56 }
 0x59b   :  { %1628 = vmatprep.mubr.f32.mxu0 %v2953_v0  ;;  %1699 = vmatprep.mubr.f32.mxu1 %v2953_v0 }
 0x59d   :  { %2458 = vmatpush1.bf16.msra.mxu0 %v3070_v60  ;;  %2490 = vmatpush1.bf16.msra.mxu1 %v3074_v63 }
 0x59e   :  { %2460 = vmatprep.subr.bf16.mxu0 %v3078_v3  ;;  %2492 = vmatprep.subr.bf16.mxu1 %v3081_v6 }
 0x5a1   :  { %2462 = vmatpush1.bf16.msra.mxu0 %v3084_v10  ;;  %2494 = vmatpush1.bf16.msra.mxu1 %v3088_v13 }
 0x5a2   :  { %2464 = vmatprep.subr.bf16.mxu0 %v3092_v16  ;;  %2496 = vmatprep.subr.bf16.mxu1 %v3095_v19 }
 0x5a5   :  { %2466 = vmatpush1.bf16.msra.mxu0 %v3098_v23  ;;  %2498 = vmatpush1.bf16.msra.mxu1 %v3102_v26 }
 0x5a6   :  { %2468 = vmatprep.subr.bf16.mxu0 %v3106_v29  ;;  %2500 = vmatprep.subr.bf16.mxu1 %v3109_v32 }
 0x5a9   :  { %2470 = vmatpush1.bf16.msra.mxu0 %v3112_v36  ;;  %2502 = vmatpush1.bf16.msra.mxu1 %v3116_v40 }
 0x5aa   :  { %2472 = vmatprep.subr.bf16.mxu0 %v3120_v44  ;;  %2504 = vmatprep.subr.bf16.mxu1 %v3123_v48 }
 0x5ad   :  { %2474 = vmatpush1.bf16.msra.mxu0 %v3126_v54  ;;  %2506 = vmatpush1.bf16.msra.mxu1 %v3130_v58 }
 0x5ae   :  { %2476 = vmatprep.subr.bf16.mxu0 %v3134_v62  ;;  %2508 = vmatprep.subr.bf16.mxu1 %v3137_v4 }
 0x5b1   :  { %2478 = vmatpush1.bf16.msra.mxu0 %v3140_v9  ;;  %2510 = vmatpush1.bf16.msra.mxu1 %v3144_v14 }
 0x5b2   :  { %2480 = vmatprep.subr.bf16.mxu0 %v3148_v18  ;;  %2512 = vmatprep.subr.bf16.mxu1 %v3151_v22 }
 0x5b5   :  { %2482 = vmatpush1.bf16.msra.mxu0 %v3154_v25  ;;  %2514 = vmatpush1.bf16.msra.mxu1 %v3158_v27 }
 0x5b6   :  { %2516 = vmatprep.subr.bf16.mxu0 %v3055_v38  ;;  %2548 = vmatprep.subr.bf16.mxu1 %v3057_v41 }
 0x66b   :  { %v1454_v30 = vpop.f32.mrb[10].mxu0  ;;  %v1525_v31 = vpop.f32.mrb[10].mxu1 }
 0x66c   :  { %v2589_v33 = vadd.f32 %v1454_v30, %v3206_v37  ;;  %v1456_v34 = vpop.f32.mrb[11].mxu0  ;;  %v1527_v45 = vpop.f32.mrb[11].mxu1  ;;  %v2605_v57 = vadd.f32 %v1525_v31, %v3215_v2 }
 0x66d   :  { %v2590_v46 = vadd.f32 %v1456_v34, %v3208_v39  ;;  %v2606_v52 = vadd.f32 %v1527_v45, %v3212_v59 }
 0x66e   :  { %v1992_v49 = vmul.f32 -1.442695, %v2589_v33 }
 0x66f   :  { %v1993_v51 = vmul.f32 -1.442695, %v2590_v46  ;;  %v1994_v55 = vmul.f32 -1.442695, %v2606_v52 }
 0x670   :  { %2733 = vpow2.f32 %v1992_v49 }
 0x671   :  { %2735 = vpow2.f32 %v1993_v51 }
 0x672   :  { %2737 = vpow2.f32 %v1994_v55 }
 0x673   :  { %2739 = vtanh.f32 %v2605_v57 }
 0x67a   :  { %v2734_v38 = vpop.eup %2733 }
 0x67b   :  { %v2736_v61 = vpop.eup %2735  ;;  %v1537_v41 = vadd.f32 1.0, %v2734_v38 }
 0x67c   :  { %v1543_v1 = vadd.f32 1.0, %v2736_v61  ;;  %v2738_v5 = vpop.eup %2737 }
 0x67d   :  { %2741 = vrcp.f32 %v1537_v41  ;;  %v2740_v7 = vpop.eup %2739  ;;  %v1550_v15 = vadd.f32 1.0, %v2738_v5 }
 0x67e   :  { %2743 = vrcp.f32 %v1543_v1 }
 0x67f   :  { %2745 = vrcp.f32 %v1550_v15 }
 0x687   :  { %v2742_v8 = vpop.eup %2741 }
 0x688   :  { %v2744_v11 = vpop.eup %2743  ;;  %v1554_v12 = vmul.f32 %v2742_v8, %v2740_v7 }
 0x689   :  { %v1553_v17 = vmul.f32 %v2744_v11, %v3389_v28  ;;  %v2746_v21 = vpop.eup %2745 }
 0x68b   :  { %v3431_v20 = vadd.f32 %v1554_v12, %v1553_v17 }
 0x68d   :  { %2747 = vtanh.f32 %v3431_v20 }
 0x697   :  { %v2748_v24 = vpop.eup %2747 }
 0x698   :  { %v1557_v35 = vmul.f32 %v2748_v24, %v2746_v21 }
 0x69a   :  { %1559 = vst [vmem:[#allocation13 + $0x28] sm:$0xff] %v1557_v35  ;;  %1629 = vmatmul.mubr.f32.vlgmr.msra.gmra.mrb[12].mxu0 %v1557_v35  ;;  %1700 = vmatmul.mubr.f32.vlgmr.msra.gmra.mrb[12].mxu1 %v1557_v35 }
 0x69b   :  { %2518 = vmatpush1.bf16.msra.mxu0 %v3059_v47  ;;  %2550 = vmatpush1.bf16.msra.mxu1 %v3062_v50 }
 0x69c   :  { %2520 = vmatprep.subr.bf16.mxu0 %v3065_v53  ;;  %2552 = vmatprep.subr.bf16.mxu1 %v3067_v56 }
 0x69d   :  { %1804 = vmatprep.mubr.f32.mxu0 %v2953_v0  ;;  %1875 = vmatprep.mubr.f32.mxu1 %v2953_v0 }
 0x69f   :  { %2522 = vmatpush1.bf16.msra.mxu0 %v3070_v60  ;;  %2554 = vmatpush1.bf16.msra.mxu1 %v3074_v63 }
 0x6a0   :  { %2524 = vmatprep.subr.bf16.mxu0 %v3078_v3  ;;  %2556 = vmatprep.subr.bf16.mxu1 %v3081_v6 }
 0x6a3   :  { %2526 = vmatpush1.bf16.msra.mxu0 %v3084_v10  ;;  %2558 = vmatpush1.bf16.msra.mxu1 %v3088_v13 }
 0x6a4   :  { %2528 = vmatprep.subr.bf16.mxu0 %v3092_v16  ;;  %2560 = vmatprep.subr.bf16.mxu1 %v3095_v19 }
 0x6a7   :  { %2530 = vmatpush1.bf16.msra.mxu0 %v3098_v23  ;;  %2562 = vmatpush1.bf16.msra.mxu1 %v3102_v26 }
 0x6a8   :  { %2532 = vmatprep.subr.bf16.mxu0 %v3106_v29  ;;  %2564 = vmatprep.subr.bf16.mxu1 %v3109_v32 }
 0x6ab   :  { %2534 = vmatpush1.bf16.msra.mxu0 %v3112_v36  ;;  %2566 = vmatpush1.bf16.msra.mxu1 %v3116_v40 }
 0x6ac   :  { %2536 = vmatprep.subr.bf16.mxu0 %v3120_v44  ;;  %2568 = vmatprep.subr.bf16.mxu1 %v3123_v48 }
 0x6af   :  { %2538 = vmatpush1.bf16.msra.mxu0 %v3126_v54  ;;  %2570 = vmatpush1.bf16.msra.mxu1 %v3130_v58 }
 0x6b0   :  { %2540 = vmatprep.subr.bf16.mxu0 %v3134_v62  ;;  %2572 = vmatprep.subr.bf16.mxu1 %v3137_v4 }
 0x6b3   :  { %2542 = vmatpush1.bf16.msra.mxu0 %v3140_v9  ;;  %2574 = vmatpush1.bf16.msra.mxu1 %v3144_v14 }
 0x6b4   :  { %2544 = vmatprep.subr.bf16.mxu0 %v3148_v18  ;;  %2576 = vmatprep.subr.bf16.mxu1 %v3151_v22 }
 0x6b7   :  { %2546 = vmatpush1.bf16.msra.mxu0 %v3154_v25  ;;  %2578 = vmatpush1.bf16.msra.mxu1 %v3158_v27 }
 0x76d   :  { %v1630_v0 = vpop.f32.mrb[12].mxu0  ;;  %v1701_v47 = vpop.f32.mrb[12].mxu1 }
 0x76e   :  { %v2591_v50 = vadd.f32 %v1630_v0, %v3206_v37  ;;  %v1632_v53 = vpop.f32.mrb[13].mxu0  ;;  %v1703_v56 = vpop.f32.mrb[13].mxu1  ;;  %v2607_v13 = vadd.f32 %v1701_v47, %v3215_v2 }
 0x76f   :  { %v2592_v60 = vadd.f32 %v1632_v53, %v3208_v39  ;;  %v2608_v6 = vadd.f32 %v1703_v56, %v3212_v59 }
 0x770   :  { %v1995_v63 = vmul.f32 -1.442695, %v2591_v50 }
 0x771   :  { %v1996_v3 = vmul.f32 -1.442695, %v2592_v60  ;;  %v1997_v10 = vmul.f32 -1.442695, %v2608_v6 }
 0x772   :  { %2749 = vpow2.f32 %v1995_v63 }
 0x773   :  { %2751 = vpow2.f32 %v1996_v3 }
 0x774   :  { %2753 = vpow2.f32 %v1997_v10 }
 0x775   :  { %2755 = vtanh.f32 %v2607_v13 }
 0x77c   :  { %v2750_v16 = vpop.eup %2749 }
 0x77d   :  { %v2752_v19 = vpop.eup %2751  ;;  %v1713_v23 = vadd.f32 1.0, %v2750_v16 }
 0x77e   :  { %v1719_v26 = vadd.f32 1.0, %v2752_v19  ;;  %v2754_v29 = vpop.eup %2753 }
 0x77f   :  { %2757 = vrcp.f32 %v1713_v23  ;;  %v2756_v32 = vpop.eup %2755  ;;  %v1726_v48 = vadd.f32 1.0, %v2754_v29 }
 0x780   :  { %2759 = vrcp.f32 %v1719_v26 }
 0x781   :  { %2761 = vrcp.f32 %v1726_v48 }
 0x789   :  { %v2758_v36 = vpop.eup %2757 }
 0x78a   :  { %v2760_v40 = vpop.eup %2759  ;;  %v1730_v44 = vmul.f32 %v2758_v36, %v2756_v32 }
 0x78b   :  { %v1729_v54 = vmul.f32 %v2760_v40, %v3431_v20  ;;  %v2762_v62 = vpop.eup %2761 }
 0x78d   :  { %v1731_v58 = vadd.f32 %v1730_v44, %v1729_v54 }
 0x78f   :  { %2763 = vtanh.f32 %v1731_v58 }
 0x799   :  { %v2764_v4 = vpop.eup %2763 }
 0x79a   :  { %v1733_v9 = vmul.f32 %v2764_v4, %v2762_v62 }
 0x79c   :  { %1735 = vst [vmem:[#allocation13 + $0x30] sm:$0xff] %v1733_v9  ;;  %1805 = vmatmul.mubr.f32.vlgmr.msra.gmra.mrb[14].mxu0 %v1733_v9  ;;  %1876 = vmatmul.mubr.f32.vlgmr.msra.gmra.mrb[14].mxu1 %v1733_v9 }
 0x86f   :  { %v1806_v14 = vpop.f32.mrb[14].mxu0  ;;  %v1877_v18 = vpop.f32.mrb[14].mxu1 }
 0x870   :  { %v2593_v22 = vadd.f32 %v1806_v14, %v3206_v37  ;;  %v1808_v25 = vpop.f32.mrb[15].mxu0  ;;  %v1879_v27 = vpop.f32.mrb[15].mxu1  ;;  %v2609_v33 = vadd.f32 %v1877_v18, %v3215_v2 }
 0x871   :  { %v2594_v28 = vadd.f32 %v1808_v25, %v3208_v39  ;;  %v2610_v30 = vadd.f32 %v1879_v27, %v3212_v59 }
 0x872   :  { %v1998_v42 = vmul.f32 -1.442695, %v2593_v22 }
 0x873   :  { %v1999_v43 = vmul.f32 -1.442695, %v2594_v28  ;;  %v2000_v31 = vmul.f32 -1.442695, %v2610_v30 }
 0x874   :  { %2765 = vpow2.f32 %v1998_v42 }
 0x875   :  { %2767 = vpow2.f32 %v1999_v43 }
 0x876   :  { %2769 = vpow2.f32 %v2000_v31 }
 0x877   :  { %2771 = vtanh.f32 %v2609_v33 }
 0x87e   :  { %v2766_v34 = vpop.eup %2765 }
 0x87f   :  { %v2768_v45 = vpop.eup %2767  ;;  %v1889_v46 = vadd.f32 1.0, %v2766_v34 }
 0x880   :  { %v1895_v49 = vadd.f32 1.0, %v2768_v45  ;;  %v2770_v37 = vpop.eup %2769 }
 0x881   :  { %2773 = vrcp.f32 %v1889_v46  ;;  %v2772_v51 = vpop.eup %2771  ;;  %v1902_v57 = vadd.f32 1.0, %v2770_v37 }
 0x882   :  { %2775 = vrcp.f32 %v1895_v49 }
 0x883   :  { %2777 = vrcp.f32 %v1902_v57 }
 0x88b   :  { %v2774_v39 = vpop.eup %2773 }
 0x88c   :  { %v2776_v52 = vpop.eup %2775  ;;  %v1906_v55 = vmul.f32 %v2774_v39, %v2772_v51 }
 0x88d   :  { %v1905_v38 = vmul.f32 %v2776_v52, %v1731_v58  ;;  %v2778_v59 = vpop.eup %2777 }
 0x88f   :  { %v1907_v61 = vadd.f32 %v1906_v55, %v1905_v38 }
 0x891   :  { %2779 = vtanh.f32 %v1907_v61  ;;  %1918 = vst [vmem:[#allocation16] sm:$0xff] %v1907_v61 }
 0x89b   :  { %v2780_v2 = vpop.eup %2779 }
 0x89c   :  { %v1909_v41 = vmul.f32 %v2780_v2, %v2778_v59 }
 0x89e   :  { %1911 = vst [vmem:[#allocation13 + $0x38] sm:$0xff] %v1909_v41  ;;  %1917 = vst [vmem:[#allocation14] sm:$0xff] %v1909_v41 }
 0x89f   :  { %2880 = shalt.err (!%p2877_p8)
}
 0x8a0   :  { %s2881_s20 = scalar_lea.hbm %s3535_s7, 128 }
 0x8a1   :  { %p2882_p9 = scmp.ne.s32.totalorder %s3535_s7, %s2881_s20  ;;  %p2885_p10 = scmp.lt.u32.totalorder %s2881_s20, %s3535_s7 }
 0x8a3   :  { %p2887_p11 = pnand %p2885_p10, %p2882_p9 }
 0x8a5   :  { %2890 = shalt.err (!%p2887_p11)
}
 0x8a6   :  { %1940 = dma.vmem_to_hbm [thread:$0]  %s1938_s11, 128, %s3535_s7, [#allocation15]  }
 0x8a7   :  { %s2891_s27 = scalar_lea.vmem %s3475_s13, 1024  ;;  %p2896_p13 = scmp.lt.s32.totalorder %s3475_s13, %s3475_s13 }
 0x8a8   :  { %p2892_p12 = scmp.ne.s32.totalorder %s3475_s13, %s2891_s27  ;;  %p2897_p0 = scmp.lt.s32.totalorder %s2891_s27, %s2891_s27 }
 0x8aa   :  { %p2898_p1 = por %p2897_p0, %p2896_p13 }
 0x8ac   :  { %p2899_p2 = pnand %p2898_p1, %p2892_p12 }
 0x8ae   :  { %2902 = shalt.err (!%p2899_p2)
}
 0x8af   :  { %s2903_s28 = scalar_lea.hbm %s3534_s6, 1024 }
 0x8b0   :  { %p2904_p3 = scmp.ne.s32.totalorder %s3534_s6, %s2903_s28  ;;  %p2907_p4 = scmp.lt.u32.totalorder %s2903_s28, %s3534_s6 }
 0x8b2   :  { %p2909_p5 = pnand %p2907_p4, %p2904_p3 }
 0x8b4   :  { %2912 = shalt.err (!%p2909_p5)
}
 0x8b5   :  { %1930 = dma.vmem_to_hbm [thread:$0]  %s3475_s13, 1024, %s3534_s6, [#allocation10], %s2948_s15, %s2948_s15, %s2949_s16  }
 0x8b6   :  { %s2913_s10 = scalar_lea.vmem %s3477_s17, 128  ;;  %p2918_p7 = scmp.lt.s32.totalorder %s3477_s17, %s3477_s17 }
 0x8b7   :  { %p2914_p6 = scmp.ne.s32.totalorder %s3477_s17, %s2913_s10  ;;  %p2919_p8 = scmp.lt.s32.totalorder %s2913_s10, %s2913_s10 }
 0x8b9   :  { %p2920_p9 = por %p2919_p8, %p2918_p7 }
 0x8bb   :  { %p2921_p10 = pnand %p2920_p9, %p2914_p6 }
 0x8bd   :  { %2924 = shalt.err (!%p2921_p10)
}
 0x8be   :  { %s2925_s12 = scalar_lea.hbm %s3536_s8, 128 }
 0x8bf   :  { %p2926_p11 = scmp.ne.s32.totalorder %s3536_s8, %s2925_s12  ;;  %p2929_p12 = scmp.lt.u32.totalorder %s2925_s12, %s3536_s8 }
 0x8c1   :  { %p2931_p13 = pnand %p2929_p12, %p2926_p11 }
 0x8c3   :  { %2934 = shalt.err (!%p2931_p13)
}
 0x8c4   :  { %1950 = dma.vmem_to_hbm [thread:$0]  %s3477_s17, 128, %s3536_s8, [#allocation15]  }
 0x8c5   :  { %2943 = dma.done.wait [#allocation10], 1024  }
 0x8c6   :  { %2944 = vsyncadd [#allocation10], 4294966272 }
 0x8c7   :  { %2945 = dma.done.wait [#allocation15], 256  }
 0x8c8   :  { %2946 = vsyncadd [#allocation15], 4294967040 }
 0x8c9   :  { %1960 = vsyncpa [#allocation9], 1 }
 0x8ca   :  { %1961 = vsyncpa [#allocation12], 1 }
 0x8cb   :  { %1962 = vsyncpa [#allocation10], 1 }
 0x8cc   :  { %1963 = vsyncpa [#allocation15], 1 }
 0x8cd   :  { %1964 = vsyncmov [#allocation7] }
 0x8d0   :  { %s1965_s16 = vpop.sfrf %1964 }
 0x8d1   :  { %p2001_p0 = scmp.ne.s32.totalorder %s1965_s16, 0 }
 0x8d3   :  { %1969 = shalt.err (%p2001_p0)  }
 0x8d4   :  { %1971 = vsyncmov [#allocation7 + $0x1] }
 0x8d7   :  { %s1972_s13 = vpop.sfrf %1971 }
 0x8d8   :  { %p2002_p1 = scmp.ne.s32.totalorder %s1972_s13, 0 }
 0x8da   :  { %1976 = shalt.err (%p2002_p1)  }

</bundles_post_ra>
